<compile_context>
chip_gen: v5e
topology: v5e:2x2
jax: 0.10.0
libtpu: 0.0.40
codegen_flags: <defaults>
</compile_context>

<pallas_src>
import functools

import jax
import jax.numpy as jnp
import numpy as np
from jax.experimental import pallas as pl
from jax.experimental.pallas import tpu as pltpu


# ----------------------------------------------------------------------------
# Fused kernel: in-VMEM halo pad -> lazy im2col -> 1 MXU matmul (3x3 conv)
# + 1 tiny MXU matmul (1x1 identity) -> f32 BN-scale/bias/ReLU -> bf16 store.
# ----------------------------------------------------------------------------
def _single_conv_kernel(x_ref, w3_ref, wid_ref, s_ref, b_ref, o_ref, pad_ref,
                        *, H, W):
    # x_ref:   (1, Cin, H*W)            activation (caller dtype)
    # w3_ref:  (C, 9*Cin)      bf16     un-scaled 3x3 weights, K=(dy*3+dx)*Cin+c
    # wid_ref: (C, Cin)        bf16     1x1 identity-conv weights
    # s_ref:   (C, 1)          f32      BN scale  gamma/sqrt(var+eps)
    # b_ref:   (C, 1)          f32      total bias (BN shift + conv/id biases)
    # o_ref:   (1, C, H*W)              output block
    # pad_ref: (Cin, (H+3)*(W+2)) bf16  flat zero-padded image (scratch)
    _, Cin, _ = x_ref.shape
    Wp = W + 2                      # padded row width (1-px halo each side)
    Mp = H * Wp                     # pseudo output width (incl. junk cols w>=W)

    xv = x_ref[0].astype(pad_ref.dtype)                     # (Cin, H*W), 1 load

    # ---- build the flat padded image: halo-only zeroing --------------------
    zrow = jnp.zeros((Cin, Wp), pad_ref.dtype)
    zcol = jnp.zeros((Cin, 1), pad_ref.dtype)
    pad_ref[:, 0:Wp] = zrow                                 # top halo row
    pad_ref[:, (H + 1) * Wp:(H + 2) * Wp] = zrow            # bottom halo row
    for h in range(H):                                      # interior rows carry
        row = jnp.concatenate(                              # their own L/R halo
            [zcol, xv[:, h * W:(h + 1) * W], zcol], axis=1)
        pad_ref[:, (h + 1) * Wp:(h + 2) * Wp] = row
    # (the trailing Wp-wide slack of the scratch only ever feeds junk columns)

    # ---- lazy im2col: the 9 taps are contiguous Mp-lane windows ------------
    pv = pad_ref[...]                                       # (Cin, (H+3)*Wp)
    slabs = [pv[:, dy * Wp + dx: dy * Wp + dx + Mp]         # (Cin, Mp) each
             for dy in range(3) for dx in range(3)]
    patches = jnp.concatenate(slabs, axis=0)                # (9*Cin, Mp)

    # ---- one MXU matmul for the 3x3 conv, one tiny one for the identity ----
    acc3 = jnp.dot(w3_ref[...], patches,
                   preferred_element_type=jnp.float32)      # (C, Mp)
    accid = jnp.dot(wid_ref[...], slabs[4],                 # centre-tap window
                    preferred_element_type=jnp.float32)     # (C, Mp)

    # ---- f32 epilogue: BN scale (kept out of bf16 weights), bias, ReLU -----
    y = jnp.maximum(s_ref[...] * acc3 + accid + b_ref[...], 0.0)

    # ---- drop junk columns (w >= W) and store lane-dense (C, H*W) ----------
    y = jnp.concatenate([y[:, h * Wp: h * Wp + W] for h in range(H)], axis=1)
    o_ref[0] = y.astype(o_ref.dtype)


# ----------------------------------------------------------------------------
# Parameter preparation (done once, in f32, outside the kernel)
# ----------------------------------------------------------------------------
def fold_params(p, eps=1e-5):
    """Kernel parameters: un-scaled bf16 3x3 weights (C, 9*Cin), bf16 1x1
    identity weights (C, Cin), and f32 per-channel BN scale / total bias
    (C, 1).  The BN scale stays an f32 epilogue multiply (not baked into the
    bf16 weights)."""
    s = p['bn_gamma'] / jnp.sqrt(p['bn_var'] + eps)                   # (C,)
    w3 = jnp.transpose(p['w3'], (2, 3, 1, 0))                         # (3,3,Cin,C)
    Cin, C = w3.shape[2], w3.shape[3]
    w3 = w3.reshape(9 * Cin, C).T.astype(jnp.bfloat16)                # (C, 9*Cin)
    wid = p['wid'][:, :, 0, 0].astype(jnp.bfloat16)                   # (C, Cin)
    bias = p['bn_beta'] + (p['b3'] - p['bn_mean']) * s + p['bid']     # (C,)
    return (w3, wid,
            s.reshape(-1, 1).astype(jnp.float32),
            bias.reshape(-1, 1).astype(jnp.float32))


# ----------------------------------------------------------------------------
# Public wrapper: NCHW in / NCHW out; only *free* reshapes on HBM tensors.
# ----------------------------------------------------------------------------
@functools.partial(jax.jit, static_argnames=("out_dtype",))
def single_conv(x_nchw, p, *, out_dtype=jnp.bfloat16):
    B, Cin, H, W = x_nchw.shape
    w3, wid, s, b = fold_params(p)
    C = w3.shape[0]
    HW = H * W

    x = x_nchw.reshape(B, Cin, HW)               # free view: no transpose/cast

    kernel = functools.partial(_single_conv_kernel, H=H, W=W)
    out = pl.pallas_call(
        kernel,
        out_shape=jax.ShapeDtypeStruct((B, C, HW), out_dtype),
        grid_spec=pltpu.PrefetchScalarGridSpec(
            num_scalar_prefetch=0,
            grid=(B,),                                           # 1 image / step
            in_specs=[
                pl.BlockSpec((1, Cin, HW), lambda bi: (bi, 0, 0)),
                pl.BlockSpec((C, 9 * Cin), lambda bi: (0, 0)),   # resident
                pl.BlockSpec((C, Cin), lambda bi: (0, 0)),       # resident
                pl.BlockSpec((C, 1), lambda bi: (0, 0)),         # resident
                pl.BlockSpec((C, 1), lambda bi: (0, 0)),         # resident
            ],
            out_specs=pl.BlockSpec((1, C, HW), lambda bi: (bi, 0, 0)),
            scratch_shapes=[
                pltpu.VMEM((Cin, (H + 3) * (W + 2)), jnp.bfloat16)],
        ),
        compiler_params=pltpu.CompilerParams(
            dimension_semantics=("parallel",),                   # both TCs on v7x
            vmem_limit_bytes=32 * 1024 * 1024),
    )(x, w3, wid, s, b)

    return out.reshape(B, C, H, W)               # free view back to NCHW


# ----------------------------------------------------------------------------
# Deterministic torch-shaped parameters and pure-JAX reference
# ----------------------------------------------------------------------------
def init_params(key, in_ch, out_ch):
    ks = jax.random.split(key, 8)

    def nrm(k, shape, scale=0.1):
        return (scale * jax.random.normal(k, shape)).astype(jnp.float32)

    return {
        # conv: Conv2d(in_ch, out_ch, 3, padding=1) + BatchNorm2d(out_ch)
        'w3': nrm(ks[0], (out_ch, in_ch, 3, 3)),        # torch OIHW
        'b3': nrm(ks[1], (out_ch,)),
        'bn_gamma': 1.0 + nrm(ks[2], (out_ch,)),
        'bn_beta': nrm(ks[3], (out_ch,)),
        'bn_mean': nrm(ks[4], (out_ch,)),
        'bn_var': 1.0 + jnp.abs(nrm(ks[5], (out_ch,))),
        # identity_conv: Conv2d(in_ch, out_ch, 1) -- always applied
        'wid': nrm(ks[6], (out_ch, in_ch, 1, 1)),
        'bid': nrm(ks[7], (out_ch,)),
    }


def reference(x_nchw, p, eps=1e-5):
    """Pure-JAX f32 transcription of SingleConv.forward (BN in inference mode)."""
    x = x_nchw.astype(jnp.float32)
    dn = ('NCHW', 'OIHW', 'NCHW')
    conv = jax.lax.conv_general_dilated(
        x, p['w3'], window_strides=(1, 1), padding=((1, 1), (1, 1)),
        dimension_numbers=dn, precision=jax.lax.Precision.HIGHEST)
    conv = conv + p['b3'][None, :, None, None]
    s = (p['bn_gamma'] / jnp.sqrt(p['bn_var'] + eps))[None, :, None, None]
    bn = s * (conv - p['bn_mean'][None, :, None, None]) \
        + p['bn_beta'][None, :, None, None]
    idn = jax.lax.conv_general_dilated(
        x, p['wid'], window_strides=(1, 1), padding=((0, 0), (0, 0)),
        dimension_numbers=dn, precision=jax.lax.Precision.HIGHEST)
    idn = idn + p['bid'][None, :, None, None]
    return jnp.maximum(bn + idn, 0.0)


# ----------------------------------------------------------------------------
if __name__ == "__main__":
    B, in_ch, out_ch, H, W = 2, 4, 32, 16, 16
    key = jax.random.PRNGKey(0)
    kx, kp = jax.random.split(key)

    x = jax.random.normal(kx, (B, in_ch, H, W), dtype=jnp.float32)    # NCHW
    params = init_params(kp, in_ch, out_ch)

    out = jax.block_until_ready(single_conv(x, params))
    ref = jax.block_until_ready(reference(x, params))

    # bf16 MXU operands + bf16 output (f32 accumulation / epilogue).
    out_f = np.asarray(out.astype(jnp.float32))
    ref_f = np.asarray(ref)
    if not np.allclose(out_f, ref_f, atol=3e-2, rtol=3e-2):
        err = float(np.max(np.abs(out_f - ref_f)))
        raise AssertionError(
            f"Pallas output mismatch vs JAX reference (max |err| = {err})")
    print("KERNEL_OK")
</pallas_src>

<mosaic_0001>
module attributes {stable_mosaic.version = 11 : i64} {
  func.func @_single_conv_kernel(%arg0: i32, %arg1: memref<1x4x256xf32, #tpu.memory_space<vmem>>, %arg2: memref<32x36xbf16, #tpu.memory_space<vmem>>, %arg3: memref<32x4xbf16, #tpu.memory_space<vmem>>, %arg4: memref<32x1xf32, #tpu.memory_space<vmem>>, %arg5: memref<32x1xf32, #tpu.memory_space<vmem>>, %arg6: memref<1x32x256xbf16, #tpu.memory_space<vmem>>, %arg7: memref<4x342xbf16, #tpu.memory_space<vmem>>) attributes {dimension_semantics = [#tpu.dimension_semantics<parallel>], iteration_bounds = array<i64: 2>, scalar_prefetch = 0 : i64, scratch_operands = 1 : i64, tpu.core_type = #tpu.core_type<tc>, window_params = [{transform_indices = @transform_0, window_bounds = array<i64: 1, 4, 256>}, {pipeline_mode = #tpu.pipeline_mode<synchronous>, transform_indices = @transform_1, window_bounds = array<i64: 32, 36>}, {pipeline_mode = #tpu.pipeline_mode<synchronous>, transform_indices = @transform_2, window_bounds = array<i64: 32, 4>}, {pipeline_mode = #tpu.pipeline_mode<synchronous>, transform_indices = @transform_3, window_bounds = array<i64: 32, 1>}, {pipeline_mode = #tpu.pipeline_mode<synchronous>, transform_indices = @transform_4, window_bounds = array<i64: 32, 1>}, {transform_indices = @transform_5, window_bounds = array<i64: 1, 32, 256>}]} {
    %c0 = arith.constant 0 : index
    %c0_0 = arith.constant 0 : index
    %c0_1 = arith.constant 0 : index
    %0 = vector.load %arg1[%c0, %c0_0, %c0_1] : memref<1x4x256xf32, #tpu.memory_space<vmem>>, vector<1x4x256xf32>
    %1 = vector.shape_cast %0 : vector<1x4x256xf32> to vector<4x256xf32>
    %2 = arith.truncf %1 : vector<4x256xf32> to vector<4x256xbf16>
    %cst = arith.constant 0.000000e+00 : bf16
    %3 = vector.broadcast %cst : bf16 to vector<4x18xbf16>
    %cst_2 = arith.constant 0.000000e+00 : bf16
    %4 = vector.broadcast %cst_2 : bf16 to vector<4x1xbf16>
    %c0_3 = arith.constant 0 : index
    %c0_4 = arith.constant 0 : index
    %5 = vector.load %arg7[%c0_3, %c0_4] : memref<4x342xbf16, #tpu.memory_space<vmem>>, vector<4x18xbf16>
    tpu.vector_store %arg7[%c0_3, %c0_4], %3 {strides = array<i32>} : memref<4x342xbf16, #tpu.memory_space<vmem>>, vector<4x18xbf16>,
    %c0_5 = arith.constant 0 : index
    %c306 = arith.constant 306 : index
    %6 = vector.load %arg7[%c0_5, %c306] : memref<4x342xbf16, #tpu.memory_space<vmem>>, vector<4x18xbf16>
    tpu.vector_store %arg7[%c0_5, %c306], %3 {strides = array<i32>} : memref<4x342xbf16, #tpu.memory_space<vmem>>, vector<4x18xbf16>,
    %7 = vector.extract_strided_slice %2 {offsets = [0, 0], sizes = [4, 16], strides = [1, 1]} : vector<4x256xbf16> to vector<4x16xbf16>
    %8 = tpu.concatenate %4, %7, %4 in 1 : vector<4x1xbf16>, vector<4x16xbf16>, vector<4x1xbf16> -> vector<4x18xbf16>
    %c0_6 = arith.constant 0 : index
    %c18 = arith.constant 18 : index
    %9 = vector.load %arg7[%c0_6, %c18] : memref<4x342xbf16, #tpu.memory_space<vmem>>, vector<4x18xbf16>
    tpu.vector_store %arg7[%c0_6, %c18], %8 {strides = array<i32>} : memref<4x342xbf16, #tpu.memory_space<vmem>>, vector<4x18xbf16>,
    %10 = vector.extract_strided_slice %2 {offsets = [0, 16], sizes = [4, 16], strides = [1, 1]} : vector<4x256xbf16> to vector<4x16xbf16>
    %11 = tpu.concatenate %4, %10, %4 in 1 : vector<4x1xbf16>, vector<4x16xbf16>, vector<4x1xbf16> -> vector<4x18xbf16>
    %c0_7 = arith.constant 0 : index
    %c36 = arith.constant 36 : index
    %12 = vector.load %arg7[%c0_7, %c36] : memref<4x342xbf16, #tpu.memory_space<vmem>>, vector<4x18xbf16>
    tpu.vector_store %arg7[%c0_7, %c36], %11 {strides = array<i32>} : memref<4x342xbf16, #tpu.memory_space<vmem>>, vector<4x18xbf16>,
    %13 = vector.extract_strided_slice %2 {offsets = [0, 32], sizes = [4, 16], strides = [1, 1]} : vector<4x256xbf16> to vector<4x16xbf16>
    %14 = tpu.concatenate %4, %13, %4 in 1 : vector<4x1xbf16>, vector<4x16xbf16>, vector<4x1xbf16> -> vector<4x18xbf16>
    %c0_8 = arith.constant 0 : index
    %c54 = arith.constant 54 : index
    %15 = vector.load %arg7[%c0_8, %c54] : memref<4x342xbf16, #tpu.memory_space<vmem>>, vector<4x18xbf16>
    tpu.vector_store %arg7[%c0_8, %c54], %14 {strides = array<i32>} : memref<4x342xbf16, #tpu.memory_space<vmem>>, vector<4x18xbf16>,
    %16 = vector.extract_strided_slice %2 {offsets = [0, 48], sizes = [4, 16], strides = [1, 1]} : vector<4x256xbf16> to vector<4x16xbf16>
    %17 = tpu.concatenate %4, %16, %4 in 1 : vector<4x1xbf16>, vector<4x16xbf16>, vector<4x1xbf16> -> vector<4x18xbf16>
    %c0_9 = arith.constant 0 : index
    %c72 = arith.constant 72 : index
    %18 = vector.load %arg7[%c0_9, %c72] : memref<4x342xbf16, #tpu.memory_space<vmem>>, vector<4x18xbf16>
    tpu.vector_store %arg7[%c0_9, %c72], %17 {strides = array<i32>} : memref<4x342xbf16, #tpu.memory_space<vmem>>, vector<4x18xbf16>,
    %19 = vector.extract_strided_slice %2 {offsets = [0, 64], sizes = [4, 16], strides = [1, 1]} : vector<4x256xbf16> to vector<4x16xbf16>
    %20 = tpu.concatenate %4, %19, %4 in 1 : vector<4x1xbf16>, vector<4x16xbf16>, vector<4x1xbf16> -> vector<4x18xbf16>
    %c0_10 = arith.constant 0 : index
    %c90 = arith.constant 90 : index
    %21 = vector.load %arg7[%c0_10, %c90] : memref<4x342xbf16, #tpu.memory_space<vmem>>, vector<4x18xbf16>
    tpu.vector_store %arg7[%c0_10, %c90], %20 {strides = array<i32>} : memref<4x342xbf16, #tpu.memory_space<vmem>>, vector<4x18xbf16>,
    %22 = vector.extract_strided_slice %2 {offsets = [0, 80], sizes = [4, 16], strides = [1, 1]} : vector<4x256xbf16> to vector<4x16xbf16>
    %23 = tpu.concatenate %4, %22, %4 in 1 : vector<4x1xbf16>, vector<4x16xbf16>, vector<4x1xbf16> -> vector<4x18xbf16>
    %c0_11 = arith.constant 0 : index
    %c108 = arith.constant 108 : index
    %24 = vector.load %arg7[%c0_11, %c108] : memref<4x342xbf16, #tpu.memory_space<vmem>>, vector<4x18xbf16>
    tpu.vector_store %arg7[%c0_11, %c108], %23 {strides = array<i32>} : memref<4x342xbf16, #tpu.memory_space<vmem>>, vector<4x18xbf16>,
    %25 = vector.extract_strided_slice %2 {offsets = [0, 96], sizes = [4, 16], strides = [1, 1]} : vector<4x256xbf16> to vector<4x16xbf16>
    %26 = tpu.concatenate %4, %25, %4 in 1 : vector<4x1xbf16>, vector<4x16xbf16>, vector<4x1xbf16> -> vector<4x18xbf16>
    %c0_12 = arith.constant 0 : index
    %c126 = arith.constant 126 : index
    %27 = vector.load %arg7[%c0_12, %c126] : memref<4x342xbf16, #tpu.memory_space<vmem>>, vector<4x18xbf16>
    tpu.vector_store %arg7[%c0_12, %c126], %26 {strides = array<i32>} : memref<4x342xbf16, #tpu.memory_space<vmem>>, vector<4x18xbf16>,
    %28 = vector.extract_strided_slice %2 {offsets = [0, 112], sizes = [4, 16], strides = [1, 1]} : vector<4x256xbf16> to vector<4x16xbf16>
    %29 = tpu.concatenate %4, %28, %4 in 1 : vector<4x1xbf16>, vector<4x16xbf16>, vector<4x1xbf16> -> vector<4x18xbf16>
    %c0_13 = arith.constant 0 : index
    %c144 = arith.constant 144 : index
    %30 = vector.load %arg7[%c0_13, %c144] : memref<4x342xbf16, #tpu.memory_space<vmem>>, vector<4x18xbf16>
    tpu.vector_store %arg7[%c0_13, %c144], %29 {strides = array<i32>} : memref<4x342xbf16, #tpu.memory_space<vmem>>, vector<4x18xbf16>,
    %31 = vector.extract_strided_slice %2 {offsets = [0, 128], sizes = [4, 16], strides = [1, 1]} : vector<4x256xbf16> to vector<4x16xbf16>
    %32 = tpu.concatenate %4, %31, %4 in 1 : vector<4x1xbf16>, vector<4x16xbf16>, vector<4x1xbf16> -> vector<4x18xbf16>
    %c0_14 = arith.constant 0 : index
    %c162 = arith.constant 162 : index
    %33 = vector.load %arg7[%c0_14, %c162] : memref<4x342xbf16, #tpu.memory_space<vmem>>, vector<4x18xbf16>
    tpu.vector_store %arg7[%c0_14, %c162], %32 {strides = array<i32>} : memref<4x342xbf16, #tpu.memory_space<vmem>>, vector<4x18xbf16>,
    %34 = vector.extract_strided_slice %2 {offsets = [0, 144], sizes = [4, 16], strides = [1, 1]} : vector<4x256xbf16> to vector<4x16xbf16>
    %35 = tpu.concatenate %4, %34, %4 in 1 : vector<4x1xbf16>, vector<4x16xbf16>, vector<4x1xbf16> -> vector<4x18xbf16>
    %c0_15 = arith.constant 0 : index
    %c180 = arith.constant 180 : index
    %36 = vector.load %arg7[%c0_15, %c180] : memref<4x342xbf16, #tpu.memory_space<vmem>>, vector<4x18xbf16>
    tpu.vector_store %arg7[%c0_15, %c180], %35 {strides = array<i32>} : memref<4x342xbf16, #tpu.memory_space<vmem>>, vector<4x18xbf16>,
    %37 = vector.extract_strided_slice %2 {offsets = [0, 160], sizes = [4, 16], strides = [1, 1]} : vector<4x256xbf16> to vector<4x16xbf16>
    %38 = tpu.concatenate %4, %37, %4 in 1 : vector<4x1xbf16>, vector<4x16xbf16>, vector<4x1xbf16> -> vector<4x18xbf16>
    %c0_16 = arith.constant 0 : index
    %c198 = arith.constant 198 : index
    %39 = vector.load %arg7[%c0_16, %c198] : memref<4x342xbf16, #tpu.memory_space<vmem>>, vector<4x18xbf16>
    tpu.vector_store %arg7[%c0_16, %c198], %38 {strides = array<i32>} : memref<4x342xbf16, #tpu.memory_space<vmem>>, vector<4x18xbf16>,
    %40 = vector.extract_strided_slice %2 {offsets = [0, 176], sizes = [4, 16], strides = [1, 1]} : vector<4x256xbf16> to vector<4x16xbf16>
    %41 = tpu.concatenate %4, %40, %4 in 1 : vector<4x1xbf16>, vector<4x16xbf16>, vector<4x1xbf16> -> vector<4x18xbf16>
    %c0_17 = arith.constant 0 : index
    %c216 = arith.constant 216 : index
    %42 = vector.load %arg7[%c0_17, %c216] : memref<4x342xbf16, #tpu.memory_space<vmem>>, vector<4x18xbf16>
    tpu.vector_store %arg7[%c0_17, %c216], %41 {strides = array<i32>} : memref<4x342xbf16, #tpu.memory_space<vmem>>, vector<4x18xbf16>,
    %43 = vector.extract_strided_slice %2 {offsets = [0, 192], sizes = [4, 16], strides = [1, 1]} : vector<4x256xbf16> to vector<4x16xbf16>
    %44 = tpu.concatenate %4, %43, %4 in 1 : vector<4x1xbf16>, vector<4x16xbf16>, vector<4x1xbf16> -> vector<4x18xbf16>
    %c0_18 = arith.constant 0 : index
    %c234 = arith.constant 234 : index
    %45 = vector.load %arg7[%c0_18, %c234] : memref<4x342xbf16, #tpu.memory_space<vmem>>, vector<4x18xbf16>
    tpu.vector_store %arg7[%c0_18, %c234], %44 {strides = array<i32>} : memref<4x342xbf16, #tpu.memory_space<vmem>>, vector<4x18xbf16>,
    %46 = vector.extract_strided_slice %2 {offsets = [0, 208], sizes = [4, 16], strides = [1, 1]} : vector<4x256xbf16> to vector<4x16xbf16>
    %47 = tpu.concatenate %4, %46, %4 in 1 : vector<4x1xbf16>, vector<4x16xbf16>, vector<4x1xbf16> -> vector<4x18xbf16>
    %c0_19 = arith.constant 0 : index
    %c252 = arith.constant 252 : index
    %48 = vector.load %arg7[%c0_19, %c252] : memref<4x342xbf16, #tpu.memory_space<vmem>>, vector<4x18xbf16>
    tpu.vector_store %arg7[%c0_19, %c252], %47 {strides = array<i32>} : memref<4x342xbf16, #tpu.memory_space<vmem>>, vector<4x18xbf16>,
    %49 = vector.extract_strided_slice %2 {offsets = [0, 224], sizes = [4, 16], strides = [1, 1]} : vector<4x256xbf16> to vector<4x16xbf16>
    %50 = tpu.concatenate %4, %49, %4 in 1 : vector<4x1xbf16>, vector<4x16xbf16>, vector<4x1xbf16> -> vector<4x18xbf16>
    %c0_20 = arith.constant 0 : index
    %c270 = arith.constant 270 : index
    %51 = vector.load %arg7[%c0_20, %c270] : memref<4x342xbf16, #tpu.memory_space<vmem>>, vector<4x18xbf16>
    tpu.vector_store %arg7[%c0_20, %c270], %50 {strides = array<i32>} : memref<4x342xbf16, #tpu.memory_space<vmem>>, vector<4x18xbf16>,
    %52 = vector.extract_strided_slice %2 {offsets = [0, 240], sizes = [4, 16], strides = [1, 1]} : vector<4x256xbf16> to vector<4x16xbf16>
    %53 = tpu.concatenate %4, %52, %4 in 1 : vector<4x1xbf16>, vector<4x16xbf16>, vector<4x1xbf16> -> vector<4x18xbf16>
    %c0_21 = arith.constant 0 : index
    %c288 = arith.constant 288 : index
    %54 = vector.load %arg7[%c0_21, %c288] : memref<4x342xbf16, #tpu.memory_space<vmem>>, vector<4x18xbf16>
    tpu.vector_store %arg7[%c0_21, %c288], %53 {strides = array<i32>} : memref<4x342xbf16, #tpu.memory_space<vmem>>, vector<4x18xbf16>,
    %c0_22 = arith.constant 0 : index
    %c0_23 = arith.constant 0 : index
    %55 = vector.load %arg7[%c0_22, %c0_23] : memref<4x342xbf16, #tpu.memory_space<vmem>>, vector<4x342xbf16>
    %56 = vector.extract_strided_slice %55 {offsets = [0, 0], sizes = [4, 288], strides = [1, 1]} : vector<4x342xbf16> to vector<4x288xbf16>
    %57 = vector.extract_strided_slice %55 {offsets = [0, 1], sizes = [4, 288], strides = [1, 1]} : vector<4x342xbf16> to vector<4x288xbf16>
    %58 = vector.extract_strided_slice %55 {offsets = [0, 2], sizes = [4, 288], strides = [1, 1]} : vector<4x342xbf16> to vector<4x288xbf16>
    %59 = vector.extract_strided_slice %55 {offsets = [0, 18], sizes = [4, 288], strides = [1, 1]} : vector<4x342xbf16> to vector<4x288xbf16>
    %60 = vector.extract_strided_slice %55 {offsets = [0, 19], sizes = [4, 288], strides = [1, 1]} : vector<4x342xbf16> to vector<4x288xbf16>
    %61 = vector.extract_strided_slice %55 {offsets = [0, 20], sizes = [4, 288], strides = [1, 1]} : vector<4x342xbf16> to vector<4x288xbf16>
    %62 = vector.extract_strided_slice %55 {offsets = [0, 36], sizes = [4, 288], strides = [1, 1]} : vector<4x342xbf16> to vector<4x288xbf16>
    %63 = vector.extract_strided_slice %55 {offsets = [0, 37], sizes = [4, 288], strides = [1, 1]} : vector<4x342xbf16> to vector<4x288xbf16>
    %64 = vector.extract_strided_slice %55 {offsets = [0, 38], sizes = [4, 288], strides = [1, 1]} : vector<4x342xbf16> to vector<4x288xbf16>
    %65 = tpu.concatenate %56, %57, %58, %59, %60, %61, %62, %63, %64 in 0 : vector<4x288xbf16>, vector<4x288xbf16>, vector<4x288xbf16>, vector<4x288xbf16>, vector<4x288xbf16>, vector<4x288xbf16>, vector<4x288xbf16>, vector<4x288xbf16>, vector<4x288xbf16> -> vector<36x288xbf16>
    %c0_24 = arith.constant 0 : index
    %c0_25 = arith.constant 0 : index
    %66 = vector.load %arg2[%c0_24, %c0_25] : memref<32x36xbf16, #tpu.memory_space<vmem>>, vector<32x36xbf16>
    %cst_26 = arith.constant dense<0.000000e+00> : vector<32x288xf32>
    %67 = tpu.matmul %66, %65, %cst_26 {dimension_numbers = #tpu.dot_dimension_numbers<[1], [0], [0], [1], [0, 0, 1, 1], [], []>} : vector<32x36xbf16>, vector<36x288xbf16>, vector<32x288xf32> -> vector<32x288xf32>
    %c0_27 = arith.constant 0 : index
    %c0_28 = arith.constant 0 : index
    %68 = vector.load %arg3[%c0_27, %c0_28] : memref<32x4xbf16, #tpu.memory_space<vmem>>, vector<32x4xbf16>
    %cst_29 = arith.constant dense<0.000000e+00> : vector<32x288xf32>
    %69 = tpu.matmul %68, %60, %cst_29 {dimension_numbers = #tpu.dot_dimension_numbers<[1], [0], [0], [1], [0, 0, 1, 1], [], []>} : vector<32x4xbf16>, vector<4x288xbf16>, vector<32x288xf32> -> vector<32x288xf32>
    %c0_30 = arith.constant 0 : index
    %c0_31 = arith.constant 0 : index
    %70 = vector.load %arg4[%c0_30, %c0_31] : memref<32x1xf32, #tpu.memory_space<vmem>>, vector<32x1xf32>
    %71 = vector.broadcast %70 : vector<32x1xf32> to vector<32x288xf32>
    %72 = arith.mulf %71, %67 : vector<32x288xf32>
    %73 = arith.addf %72, %69 : vector<32x288xf32>
    %c0_32 = arith.constant 0 : index
    %c0_33 = arith.constant 0 : index
    %74 = vector.load %arg5[%c0_32, %c0_33] : memref<32x1xf32, #tpu.memory_space<vmem>>, vector<32x1xf32>
    %75 = vector.broadcast %74 : vector<32x1xf32> to vector<32x288xf32>
    %76 = arith.addf %73, %75 : vector<32x288xf32>
    %cst_34 = arith.constant 0.000000e+00 : f32
    %77 = vector.broadcast %cst_34 : f32 to vector<32x288xf32>
    %78 = arith.maximumf %76, %77 : vector<32x288xf32>
    %79 = vector.extract_strided_slice %78 {offsets = [0, 0], sizes = [32, 16], strides = [1, 1]} : vector<32x288xf32> to vector<32x16xf32>
    %80 = vector.extract_strided_slice %78 {offsets = [0, 18], sizes = [32, 16], strides = [1, 1]} : vector<32x288xf32> to vector<32x16xf32>
    %81 = vector.extract_strided_slice %78 {offsets = [0, 36], sizes = [32, 16], strides = [1, 1]} : vector<32x288xf32> to vector<32x16xf32>
    %82 = vector.extract_strided_slice %78 {offsets = [0, 54], sizes = [32, 16], strides = [1, 1]} : vector<32x288xf32> to vector<32x16xf32>
    %83 = vector.extract_strided_slice %78 {offsets = [0, 72], sizes = [32, 16], strides = [1, 1]} : vector<32x288xf32> to vector<32x16xf32>
    %84 = vector.extract_strided_slice %78 {offsets = [0, 90], sizes = [32, 16], strides = [1, 1]} : vector<32x288xf32> to vector<32x16xf32>
    %85 = vector.extract_strided_slice %78 {offsets = [0, 108], sizes = [32, 16], strides = [1, 1]} : vector<32x288xf32> to vector<32x16xf32>
    %86 = vector.extract_strided_slice %78 {offsets = [0, 126], sizes = [32, 16], strides = [1, 1]} : vector<32x288xf32> to vector<32x16xf32>
    %87 = vector.extract_strided_slice %78 {offsets = [0, 144], sizes = [32, 16], strides = [1, 1]} : vector<32x288xf32> to vector<32x16xf32>
    %88 = vector.extract_strided_slice %78 {offsets = [0, 162], sizes = [32, 16], strides = [1, 1]} : vector<32x288xf32> to vector<32x16xf32>
    %89 = vector.extract_strided_slice %78 {offsets = [0, 180], sizes = [32, 16], strides = [1, 1]} : vector<32x288xf32> to vector<32x16xf32>
    %90 = vector.extract_strided_slice %78 {offsets = [0, 198], sizes = [32, 16], strides = [1, 1]} : vector<32x288xf32> to vector<32x16xf32>
    %91 = vector.extract_strided_slice %78 {offsets = [0, 216], sizes = [32, 16], strides = [1, 1]} : vector<32x288xf32> to vector<32x16xf32>
    %92 = vector.extract_strided_slice %78 {offsets = [0, 234], sizes = [32, 16], strides = [1, 1]} : vector<32x288xf32> to vector<32x16xf32>
    %93 = vector.extract_strided_slice %78 {offsets = [0, 252], sizes = [32, 16], strides = [1, 1]} : vector<32x288xf32> to vector<32x16xf32>
    %94 = vector.extract_strided_slice %78 {offsets = [0, 270], sizes = [32, 16], strides = [1, 1]} : vector<32x288xf32> to vector<32x16xf32>
    %95 = tpu.concatenate %79, %80, %81, %82, %83, %84, %85, %86, %87, %88, %89, %90, %91, %92, %93, %94 in 1 : vector<32x16xf32>, vector<32x16xf32>, vector<32x16xf32>, vector<32x16xf32>, vector<32x16xf32>, vector<32x16xf32>, vector<32x16xf32>, vector<32x16xf32>, vector<32x16xf32>, vector<32x16xf32>, vector<32x16xf32>, vector<32x16xf32>, vector<32x16xf32>, vector<32x16xf32>, vector<32x16xf32>, vector<32x16xf32> -> vector<32x256xf32>
    %96 = arith.truncf %95 : vector<32x256xf32> to vector<32x256xbf16>
    %c0_35 = arith.constant 0 : index
    %c0_36 = arith.constant 0 : index
    %c0_37 = arith.constant 0 : index
    %97 = vector.load %arg6[%c0_35, %c0_36, %c0_37] : memref<1x32x256xbf16, #tpu.memory_space<vmem>>, vector<1x32x256xbf16>
    %98 = vector.shape_cast %97 : vector<1x32x256xbf16> to vector<32x256xbf16>
    %99 = vector.shape_cast %96 : vector<32x256xbf16> to vector<1x32x256xbf16>
    tpu.vector_store %arg6[%c0_35, %c0_36, %c0_37], %99 {strides = array<i32>} : memref<1x32x256xbf16, #tpu.memory_space<vmem>>, vector<1x32x256xbf16>,
    return
  }
  func.func @transform_0(%arg0: i32) -> (i32, i32, i32) {
    %c0_i32 = arith.constant 0 : i32
    %c0_i32_0 = arith.constant 0 : i32
    %c0_i32_1 = arith.constant 0 : i32
    return %arg0, %c0_i32, %c0_i32_0 : i32, i32, i32
  }
  func.func @transform_1(%arg0: i32) -> (i32, i32) {
    %c0_i32 = arith.constant 0 : i32
    %c0_i32_0 = arith.constant 0 : i32
    %c0_i32_1 = arith.constant 0 : i32
    return %c0_i32, %c0_i32_0 : i32, i32
  }
  func.func @transform_2(%arg0: i32) -> (i32, i32) {
    %c0_i32 = arith.constant 0 : i32
    %c0_i32_0 = arith.constant 0 : i32
    %c0_i32_1 = arith.constant 0 : i32
    return %c0_i32, %c0_i32_0 : i32, i32
  }
  func.func @transform_3(%arg0: i32) -> (i32, i32) {
    %c0_i32 = arith.constant 0 : i32
    %c0_i32_0 = arith.constant 0 : i32
    %c0_i32_1 = arith.constant 0 : i32
    return %c0_i32, %c0_i32_0 : i32, i32
  }
  func.func @transform_4(%arg0: i32) -> (i32, i32) {
    %c0_i32 = arith.constant 0 : i32
    %c0_i32_0 = arith.constant 0 : i32
    %c0_i32_1 = arith.constant 0 : i32
    return %c0_i32, %c0_i32_0 : i32, i32
  }
  func.func @transform_5(%arg0: i32) -> (i32, i32, i32) {
    %c0_i32 = arith.constant 0 : i32
    %c0_i32_0 = arith.constant 0 : i32
    %c0_i32_1 = arith.constant 0 : i32
    return %arg0, %c0_i32, %c0_i32_0 : i32, i32, i32
  }
}

</mosaic_0001>

<bundles_post_ra>
// kernel: single_conv.1
= control target key start
LH: loop header
LB: loop body
LE: loop exit
PB: predicated region body
PF: predicated region fallthrough
CT: control target
= control target key end

     0   :  { %s1596_s18 = smov 0   ;;  %s2048_s0 = inlined_call_operand.vmem [shape: f32[2,4,256], index: 0, kind: input, shape index: {}]   ;;  %s2049_s1 = inlined_call_operand.vmem [shape: bf16[32,36], index: 1, kind: input, shape index: {}]   ;;  %s2050_s2 = inlined_call_operand.vmem [shape: bf16[32,4], index: 2, kind: input, shape index: {}]   ;;  %s2051_s3 = inlined_call_operand.vmem [shape: f32[32,1], index: 3, kind: input, shape index: {}]   ;;  %s2052_s4 = inlined_call_operand.vmem [shape: f32[32,1], index: 4, kind: input, shape index: {}]   ;;  %s2053_s5 = inlined_call_operand.vmem [shape: bf16[2,32,256], index: 5, kind: output, shape index: {}]  }
   0x1 LB: > { %s1248_s19 = sadd.s32 4294967295, %s1524_s18   ;;  %p1252_p0 = scmp.ge.s32.totalorder %s1524_s18, 1  ;;  %s1524_s18 = sphi %s1596_s18, %s15_s18  }
   0x2   : > { %p187_p1 = scmp.lt.s32.totalorder %s1524_s18, 3 }
   0x4   : > { %p188_p2 = pnand %p1252_p0, %p187_p1 }
   0x5   : > { %p215_p3 = scmp.lt.s32.totalorder (!%p188_p2), %s1248_s19, 1  ;;  %s1526_s24 = smov (!%p188_p2), 97  }
   0x6   : > { %191 = sbr.rel (%p188_p2) target bundleno = 871 (0x367), region = 40  ;;  %s1527_s25 = smov (!%p188_p2), 1  }
   0x7   : > { %s1528_s26 = smov (!%p188_p2), 33   ;;  %s1529_s27 = smov (!%p188_p2), 81  }
   0x8   : > { %s1530_s28 = smov (!%p188_p2), 113   ;;  %s1531_s29 = smov (!%p188_p2), 65  }
   0x9   : > { %s1532_s30 = smov (!%p188_p2), 49   ;;  %s1533_s6 = smov (!%p188_p2), 17  }
   0xa   : > { %s1534_s7 = smov (!%p188_p2), 54   ;;  %s1535_s8 = smov (!%p188_p2), 18  }
   0xb   : > { %s2055_s19 = smov (!%p215_p3, %s1248_s19), 1  ;;  %vm243_vm0 = vcmask 7168   ;;  %vm247_vm1 = vcmask 138240   ;;  %s1536_s9 = smov 72   ;;  %vm234_vm2 = vcmask 140288   ;;  %v1550_v56 = vmov 0  }
   0xc   : > { %s1287_s20 = sshll.u32 %s2055_s19, 3  ;;  %s1537_s10 = smov 36   ;;  %235 = vst.msk [vmem:[#allocation2] sm:$0x3] %vm234_vm2, %v1550_v56  ;;  %1347 = vset.pattern.permute.xlu1 %v1550_v56  ;;  %1346 = vset.pattern.permute.xlu0 %v1550_v56  ;;  %vm253_vm3 = vcmask 287888   ;;  %vm264_vm4 = vcmask 435488  }
   0xd   : > { %s219_s23 = scalar_lea.vmem %s2048_s0, %s1287_s20  ;;  %s1538_s11 = smov 90   ;;  %1345 = vset.pattern.permute.xlu2 %v1550_v56  ;;  %vm275_vm5 = vcmask 583088   ;;  %vm236_vm6 = vcmask 550288   ;;  %vm286_vm7 = vcmask 730688   ;;  %vm297_vm8 = vcmask 878288  }
   0xe   : > { %v226_v0 = vld [vmem:[%s219_s23] sm:$0xff]  ;;  %s1539_s12 = smov 126   ;;  %s1540_s13 = smov 108   ;;  %237 = vst.msk [vmem:[#allocation2 + $0x4] sm:$0x3] %vm236_vm6, %v1550_v56  ;;  %vm322_vm9 = vcmask 1042416  }
   0xf   : > { %228 = vst [vmem:[#allocation1] ss:$2 sm:$0xff] %v226_v0  ;;  %s1541_s14 = smov 34   ;;  %s1542_s15 = smov 52   ;;  %vm323_vm10 = vcmask 125954   ;;  %vm319_vm11 = vcmask 1031168  }
  0x10   : > { %s1543_s16 = smov 16   ;;  %s1544_s17 = smov 124   ;;  %vm308_vm12 = vcmask 1025888   ;;  %vm324_vm13 = vmor %vm323_vm10, %vm322_vm9  ;;  %vm335_vm14 = vcmask 271488   ;;  %vm348_vm15 = vcmask 419088   ;;  %vm406_vm2 = vcmask 1042400  }
  0x11   : > { %s1545_s20 = smov 88   ;;  %s1546_s21 = smov 70   ;;  %vm392_vm6 = vcmask 1009488   ;;  %vm430_vm9 = vcmask 402688   ;;  %vm452_vm10 = vcmask 1039360  }
  0x12   : > { %s1547_s22 = smov 14   ;;  %s1548_s23 = smov 32  }
  0x16   : > { %v229_v1 = vld.sshfl [vmem:[#allocation1] sm:$0xff pattern:$0x75316420]  ;;  %v230_v2 = vld.sshfl [vmem:[#allocation1 + $0x8] sm:$0xff pattern:$0x75316420] }
  0x17   : > { %v233_v3 = vpack.c.bf16 %v230_v2, %v229_v1 }
  0x19   : > { %v239_v4 = vunpack.c.l.b16 %v233_v3  ;;  %v337_v6 = vunpack.c.h.b16 %v233_v3 }
  0x1b   : > { %v240_v5 = vpack.c.b16 %v239_v4, %v239_v4  ;;  %v338_v7 = vpack.c.b16 %v337_v6, %v337_v6 }
  0x1d   : > { %266 = vrot.lane.b32.xlu1 %v240_v5, %s1526_s24  ;;  %241 = vrot.lane.b32.xlu0 %v240_v5, %s1527_s25 }
  0x1e   : > { %310 = vrot.lane.b32.xlu2 %v240_v5, %s1528_s26 }
  0x25   : > { %277 = vrot.lane.b32.xlu1 %v240_v5, %s1529_s27  ;;  %255 = vrot.lane.b32.xlu0 %v240_v5, %s1530_s28 }
  0x26   : > { %288 = vrot.lane.b32.xlu2 %v240_v5, %s1531_s29 }
  0x2d   : > { %299 = vrot.lane.b32.xlu0 %v240_v5, %s1532_s30  ;;  %326 = vrot.lane.b32.xlu1 %v240_v5, %s1533_s6 }
  0x2e   : > { %339 = vrot.lane.b32.xlu2 %v338_v7, %s1527_s25  ;;  %s1551_s25 = smov 127  }
  0x35   : > { %350 = vrot.lane.b32.xlu0 %v338_v7, %s1530_s28  ;;  %361 = vrot.lane.b32.xlu1 %v338_v7, %s1526_s24  ;;  %s1549_s24 = smov 106   ;;  %s1554_s28 = smov 92  }
  0x36   : > { %394 = vrot.lane.b32.xlu2 %v338_v7, %s1532_s30 }
  0x3d   : > { %372 = vrot.lane.b32.xlu0 %v338_v7, %s1529_s27  ;;  %383 = vrot.lane.b32.xlu1 %v338_v7, %s1531_s29  ;;  %s1553_s27 = smov 109   ;;  %s1555_s29 = smov 91  }
  0x3e   : > { %410 = vrot.lane.b32.xlu2 %v338_v7, %s1528_s26  ;;  %s1552_s26 = smov 110  }
  0x45   : > { %421 = vrot.lane.b32.xlu0 %v338_v7, %s1533_s6 }
  0x78   : > { %v311_v8 = vpop.permute.xlu2 %310 }
  0x79   : > { %v313_v26 = vsel %vm243_vm0, 0, %v311_v8 }
  0x7a   : > { %v314_v31 = vsel %vm247_vm1, %v313_v26, 0 }
  0x80   : > { %v289_v9 = vpop.permute.xlu2 %288 }
  0x81   : > { %v291_v16 = vsel %vm243_vm0, 0, %v289_v9 }
  0x82   : > { %v292_v21 = vsel %vm247_vm1, %v291_v16, 0 }
  0x88   : > { %v340_v22 = vpop.permute.xlu2 %339 }
  0x89   : > { %v342_v25 = vsel %vm243_vm0, 0, %v340_v22 }
  0x8a   : > { %v343_v30 = vsel %vm247_vm1, %v342_v25, 0 }
  0x8f   : > { %v267_v10 = vpop.permute.xlu1 %266  ;;  %v242_v11 = vpop.permute.xlu0 %241 }
  0x90   : > { %v269_v12 = vsel %vm243_vm0, 0, %v267_v10  ;;  %v246_v13 = vsel %vm243_vm0, 0, %v242_v11  ;;  %v395_v33 = vpop.permute.xlu2 %394 }
  0x91   : > { %v270_v14 = vsel %vm247_vm1, %v269_v12, 0  ;;  %v248_v15 = vsel %vm247_vm1, %v246_v13, 0  ;;  %v397_v35 = vsel %vm243_vm0, 0, %v395_v33 }
  0x92   : > { %272 = vrot.lane.b32.xlu0 %v270_v14, %s1534_s7  ;;  %250 = vrot.lane.b32.xlu1 %v248_v15, %s1535_s8  ;;  %v398_v40 = vsel %vm247_vm1, %v397_v35, 0 }
  0x97   : > { %v278_v17 = vpop.permute.xlu1 %277  ;;  %v256_v18 = vpop.permute.xlu0 %255 }
  0x98   : > { %v280_v19 = vsel %vm243_vm0, 0, %v278_v17  ;;  %v258_v20 = vsel %vm243_vm0, 0, %v256_v18  ;;  %v411_v42 = vpop.permute.xlu2 %410 }
  0x99   : > { %v281_v23 = vsel %vm247_vm1, %v280_v19, 0  ;;  %v259_v24 = vsel %vm247_vm1, %v258_v20, 0  ;;  %v413_v44 = vsel %vm243_vm0, 0, %v411_v42 }
  0x9a   : > { %283 = vrot.lane.b32.xlu1 %v281_v23, %s1536_s9  ;;  %261 = vrot.lane.b32.xlu2 %v259_v24, %s1537_s10  ;;  %v414_v48 = vsel %vm247_vm1, %v413_v44, 0 }
  0x9b   : > { %294 = vrot.lane.b32.xlu0 %v292_v21, %s1538_s11 }
  0x9f   : > { %v300_v27 = vpop.permute.xlu0 %299  ;;  %v327_v28 = vpop.permute.xlu1 %326 }
  0xa0   : > { %v302_v29 = vsel %vm243_vm0, 0, %v300_v27  ;;  %v329_v34 = vsel %vm243_vm0, 0, %v327_v28 }
  0xa1   : > { %v303_v32 = vsel %vm247_vm1, %v302_v29, 0  ;;  %v330_v37 = vsel %vm247_vm1, %v329_v34, 0 }
  0xa2   : > { %316 = vrot.lane.b32.xlu2 %v314_v31, %s1539_s12  ;;  %305 = vrot.lane.b32.xlu1 %v303_v32, %s1540_s13 }
  0xa3   : > { %345 = vrot.lane.b32.xlu0 %v343_v30, %s1541_s14  ;;  %s1557_s14 = smov 116  }
  0xa7   : > { %v351_v36 = vpop.permute.xlu0 %350  ;;  %v362_v38 = vpop.permute.xlu1 %361 }
  0xa8   : > { %v353_v39 = vsel %vm243_vm0, 0, %v351_v36  ;;  %v364_v43 = vsel %vm243_vm0, 0, %v362_v38 }
  0xa9   : > { %v354_v41 = vsel %vm247_vm1, %v353_v39, 0  ;;  %v365_v46 = vsel %vm247_vm1, %v364_v43, 0 }
  0xaa   : > { %356 = vrot.lane.b32.xlu1 %v354_v41, %s1542_s15  ;;  %332 = vrot.lane.b32.xlu2 %v330_v37, %s1543_s16  ;;  %s1558_s15 = smov 118   ;;  %s1559_s16 = smov 120  }
  0xab   : > { %400 = vrot.lane.b32.xlu0 %v398_v40, %s1544_s17 }
  0xaf   : > { %v373_v45 = vpop.permute.xlu0 %372  ;;  %v384_v50 = vpop.permute.xlu1 %383 }
  0xb0   : > { %v375_v47 = vsel %vm243_vm0, 0, %v373_v45  ;;  %v386_v51 = vsel %vm243_vm0, 0, %v384_v50 }
  0xb1   : > { %v376_v49 = vsel %vm247_vm1, %v375_v47, 0  ;;  %v387_v53 = vsel %vm247_vm1, %v386_v51, 0 }
  0xb2   : > { %378 = vrot.lane.b32.xlu1 %v376_v49, %s1545_s20  ;;  %367 = vrot.lane.b32.xlu2 %v365_v46, %s1546_s21  ;;  %s1560_s20 = smov 100   ;;  %s1561_s21 = smov 102  }
  0xb3   : > { %416 = vrot.lane.b32.xlu0 %v414_v48, %s1547_s22  ;;  %s1562_s22 = smov 104  }
  0xb7   : > { %v422_v52 = vpop.permute.xlu0 %421 }
  0xb8   : > { %v424_v54 = vsel %vm243_vm0, 0, %v422_v52  ;;  %vm359_vm0 = vcmask 566688  }
  0xb9   : > { %v425_v55 = vsel %vm247_vm1, %v424_v54, 0  ;;  %vm370_vm1 = vcmask 714288  }
  0xba   : > { %427 = vrot.lane.b32.xlu1 %v425_v55, %s1548_s23  ;;  %389 = vrot.lane.b32.xlu2 %v387_v53, %s1549_s24  ;;  %s1563_s23 = smov 112  }
  0xf4   : > { %v262_v57 = vpop.permute.xlu2 %261 }
  0xfc   : > { %v317_v60 = vpop.permute.xlu2 %316 }
  0xfd   : > { %v318_v0 = vrot.slane %v317_v60, 6 }
  0xff   : > { %v320_v2 = vsel %vm319_vm11, %v318_v0, %v317_v60  ;;  %v810_v0 = vld [vmem:[%s2051_s3 + $0x10] sm:$0xff] }
 0x104   : > { %v251_v58 = vpop.permute.xlu1 %250  ;;  %v273_v59 = vpop.permute.xlu0 %272 }
 0x105   : > { %254 = vst.msk [vmem:[#allocation2] sm:$0x3] %vm253_vm3, %v251_v58  ;;  %v333_v63 = vpop.permute.xlu2 %332  ;;  %vm407_vm3 = vcmask 109570  }
 0x106   : > { %265 = vst.msk [vmem:[#allocation2] sm:$0x3] %vm264_vm4, %v262_v57  ;;  %vm381_vm4 = vcmask 861888  }
 0x107   : > { %276 = vst.msk [vmem:[#allocation2] sm:$0x3] %vm275_vm5, %v273_v59  ;;  %vm403_vm5 = vcmask 1014784  }
 0x10c   : > { %v284_v61 = vpop.permute.xlu1 %283 }
 0x10d   : > { %287 = vst.msk [vmem:[#allocation2] sm:$0x3] %vm286_vm7, %v284_v61  ;;  %v295_v62 = vpop.permute.xlu0 %294  ;;  %v368_v4 = vpop.permute.xlu2 %367  ;;  %vm408_vm7 = vmor %vm407_vm3, %vm406_vm2  ;;  %vm501_vm2 = vcmask 891904   ;;  %vm552_vm3 = vcmask 744448  }
 0x10e   : > { %298 = vst.msk [vmem:[#allocation2] sm:$0x3] %vm297_vm8, %v295_v62  ;;  %vm419_vm8 = vcmask 255088  }
 0x114   : > { %v306_v1 = vpop.permute.xlu1 %305 }
 0x115   : > { %309 = vst.msk [vmem:[#allocation2] sm:$0x3] %vm308_vm12, %v306_v1  ;;  %v346_v3 = vpop.permute.xlu0 %345  ;;  %v390_v8 = vpop.permute.xlu2 %389  ;;  %vm571_vm12 = vcmask 1041408  }
 0x116   : > { %325 = vst.msk [vmem:[#allocation2] sm:$0xf] %vm324_vm13, %v320_v2  ;;  %vm578_vm13 = vcmask 1043456  }
 0x117   : > { %336 = vst.msk [vmem:[#allocation2 + $0x2] sm:$0x3] %vm335_vm14, %v333_v63  ;;  %vm568_vm14 = vcmask 736256  }
 0x118   : > { %349 = vst.msk [vmem:[#allocation2 + $0x2] sm:$0x3] %vm348_vm15, %v346_v3  ;;  %v856_v3 = vld [vmem:[%s2052_s4] sm:$0xff]  ;;  %vm518_vm15 = vcmask 883712  }
 0x11c   : > { %v357_v5 = vpop.permute.xlu1 %356 }
 0x11d   : > { %360 = vst.msk [vmem:[#allocation2 + $0x2] sm:$0x3] %vm359_vm0, %v357_v5  ;;  %v401_v6 = vpop.permute.xlu0 %400  ;;  %vm535_vm0 = vcmask 752640  }
 0x11e   : > { %371 = vst.msk [vmem:[#allocation2 + $0x2] sm:$0x3] %vm370_vm1, %v368_v4  ;;  %v402_v7 = vrot.slane %v401_v6, 6  ;;  %vm585_vm1 = vcmask 1045504  }
 0x120   : > { %v404_v11 = vsel %vm403_vm5, %v402_v7, %v401_v6  ;;  %v809_v7 = vld [vmem:[%s2051_s3 + $0x8] sm:$0xff]  ;;  %vm633_vm5 = vcmask 293888  }
 0x124   : > { %v379_v9 = vpop.permute.xlu1 %378 }
 0x125   : > { %382 = vst.msk [vmem:[#allocation2 + $0x2] sm:$0x3] %vm381_vm4, %v379_v9  ;;  %v417_v10 = vpop.permute.xlu0 %416  ;;  %vm485_vm4 = vcmask 900096  }
 0x126   : > { %393 = vst.msk [vmem:[#allocation2 + $0x2] sm:$0x3] %vm392_vm6, %v390_v8  ;;  %v859_v8 = vld [vmem:[%s2052_s4 + $0x18] sm:$0xff]  ;;  %vm1122_vm6 = vcmask 130048  }
 0x127   : > { %409 = vst.msk [vmem:[#allocation2 + $0x2] sm:$0xf] %vm408_vm7, %v404_v11  ;;  %v858_v11 = vld [vmem:[%s2052_s4 + $0x10] sm:$0xff]  ;;  %vm1127_vm7 = vcmask 261120  }
 0x128   : > { %420 = vst.msk [vmem:[#allocation2 + $0x4] sm:$0x3] %vm419_vm8, %v417_v10  ;;  %vm1132_vm8 = vcmask 392192  }
 0x12c   : > { %v428_v12 = vpop.permute.xlu1 %427 }
 0x12d   : > { %431 = vst.msk [vmem:[#allocation2 + $0x4] sm:$0x3] %vm430_vm9, %v428_v12  ;;  %vm1137_vm9 = vcmask 523264  }
 0x134   : > { %v1648_v13 = vld [vmem:[#allocation2] sm:$0x3f] }
 0x135   : > { %434 = vst [vmem:[#allocation1] ss:$4 sm:$0xff] %v1648_v13 }
 0x13c   : > { %v1651_v14 = vld.sshfl [vmem:[#allocation1] sm:$0xff pattern:$0x73625140]  ;;  %v1653_v15 = vld.sshfl [vmem:[#allocation1 + $0x8] sm:$0xff pattern:$0x73625140] }
 0x13d   : > { %v1655_v16 = vld.sshfl [vmem:[#allocation1 + $0x10] sm:$0xff pattern:$0x73625140] }
 0x13e   : > { %439 = vst [vmem:[#allocation1 + $0x1] ss:$4 sm:$0xff] %v1648_v13 }
 0x145   : > { %v444_v17 = vld.sshfl [vmem:[#allocation1 + $0x10] sm:$0xff pattern:$0x73625140]  ;;  %v442_v18 = vld.sshfl [vmem:[#allocation1 + $0x8] sm:$0xff pattern:$0x73625140] }
 0x146   : > { %450 = vrot.lane.b32.xlu1 %v444_v17, %s1551_s25  ;;  %448 = vrot.lane.b32.xlu0 %v442_v18, %s1551_s25  ;;  %v440_v19 = vld.sshfl [vmem:[#allocation1] sm:$0xff pattern:$0x73625140] }
 0x147   : > { %446 = vrot.lane.b32.xlu2 %v440_v19, %s1551_s25  ;;  %456 = vst [vmem:[#allocation1 + $0x2] ss:$4 sm:$0xff] %v1648_v13  ;;  %s1564_s25 = smov 114  }
 0x14e   : > { %v461_v20 = vld.sshfl [vmem:[#allocation1 + $0x10] sm:$0xff pattern:$0x73625140]  ;;  %v459_v21 = vld.sshfl [vmem:[#allocation1 + $0x8] sm:$0xff pattern:$0x73625140] }
 0x14f   : > { %467 = vrot.lane.b32.xlu1 %v461_v20, %s1539_s12  ;;  %465 = vrot.lane.b32.xlu0 %v459_v21, %s1539_s12  ;;  %v457_v22 = vld.sshfl [vmem:[#allocation1] sm:$0xff pattern:$0x73625140] }
 0x150   : > { %463 = vrot.lane.b32.xlu2 %v457_v22, %s1539_s12  ;;  %472 = vst [vmem:[#allocation1 + $0x3] ss:$4 sm:$0xff] %v1648_v13  ;;  %v808_v20 = vld [vmem:[%s2051_s3] sm:$0xff] }
 0x157   : > { %v477_v23 = vld.sshfl [vmem:[#allocation1 + $0x10] sm:$0xff pattern:$0x73625140]  ;;  %v475_v24 = vld.sshfl [vmem:[#allocation1 + $0x8] sm:$0xff pattern:$0x73625140] }
 0x158   : > { %483 = vrot.lane.b32.xlu1 %v477_v23, %s1552_s26  ;;  %481 = vrot.lane.b32.xlu0 %v475_v24, %s1552_s26  ;;  %v473_v25 = vld.sshfl [vmem:[#allocation1] sm:$0xff pattern:$0x73625140] }
 0x159   : > { %479 = vrot.lane.b32.xlu2 %v473_v25, %s1552_s26  ;;  %488 = vst [vmem:[#allocation1] ss:$4 sm:$0xff] %v1648_v13 }
 0x160   : > { %v489_v26 = vld.sshfl [vmem:[#allocation1] sm:$0xff pattern:$0x73625140]  ;;  %v491_v27 = vld.sshfl [vmem:[#allocation1 + $0x8] sm:$0xff pattern:$0x73625140] }
 0x161   : > { %v493_v28 = vld.sshfl [vmem:[#allocation1 + $0x10] sm:$0xff pattern:$0x73625140]  ;;  %497 = vrot.lane.b32.xlu0 %v491_v27, %s1553_s27  ;;  %495 = vrot.lane.b32.xlu2 %v489_v26, %s1553_s27 }
 0x162   : > { %505 = vst [vmem:[#allocation1 + $0x1] ss:$4 sm:$0xff] %v1648_v13  ;;  %499 = vrot.lane.b32.xlu1 %v493_v28, %s1553_s27 }
 0x169   : > { %v506_v29 = vld.sshfl [vmem:[#allocation1] sm:$0xff pattern:$0x73625140]  ;;  %v508_v30 = vld.sshfl [vmem:[#allocation1 + $0x8] sm:$0xff pattern:$0x73625140] }
 0x16a   : > { %v510_v31 = vld.sshfl [vmem:[#allocation1 + $0x10] sm:$0xff pattern:$0x73625140]  ;;  %514 = vrot.lane.b32.xlu0 %v508_v30, %s1540_s13  ;;  %512 = vrot.lane.b32.xlu2 %v506_v29, %s1540_s13 }
 0x16b   : > { %522 = vst [vmem:[#allocation1 + $0x2] ss:$4 sm:$0xff] %v1648_v13  ;;  %516 = vrot.lane.b32.xlu1 %v510_v31, %s1540_s13 }
 0x172   : > { %v523_v32 = vld.sshfl [vmem:[#allocation1] sm:$0xff pattern:$0x73625140]  ;;  %v525_v33 = vld.sshfl [vmem:[#allocation1 + $0x8] sm:$0xff pattern:$0x73625140] }
 0x173   : > { %v527_v34 = vld.sshfl [vmem:[#allocation1 + $0x10] sm:$0xff pattern:$0x73625140]  ;;  %531 = vrot.lane.b32.xlu0 %v525_v33, %s1554_s28  ;;  %529 = vrot.lane.b32.xlu2 %v523_v32, %s1554_s28 }
 0x174   : > { %539 = vst [vmem:[#allocation1 + $0x3] ss:$4 sm:$0xff] %v1648_v13  ;;  %533 = vrot.lane.b32.xlu1 %v527_v34, %s1554_s28  ;;  %v1289_v34 = vld [vmem:[%s2049_s1] sm:$0xff] }
 0x17b   : > { %v542_v35 = vld.sshfl [vmem:[#allocation1 + $0x8] sm:$0xff pattern:$0x73625140]  ;;  %v544_v36 = vld.sshfl [vmem:[#allocation1 + $0x10] sm:$0xff pattern:$0x73625140] }
 0x17c   : > { %550 = vrot.lane.b32.xlu0 %v544_v36, %s1555_s29  ;;  %v540_v37 = vld.sshfl [vmem:[#allocation1] sm:$0xff pattern:$0x73625140] }
 0x17d   : > { %546 = vrot.lane.b32.xlu2 %v540_v37, %s1555_s29  ;;  %555 = vst [vmem:[#allocation1] ss:$4 sm:$0xff] %v1648_v13 }
 0x184   : > { %v560_v38 = vld.sshfl [vmem:[#allocation1 + $0x10] sm:$0xff pattern:$0x73625140]  ;;  %v558_v39 = vld.sshfl [vmem:[#allocation1 + $0x8] sm:$0xff pattern:$0x73625140] }
 0x185   : > { %566 = vrot.lane.b32.xlu0 %v560_v38, %s1538_s11  ;;  %564 = vrot.lane.b32.xlu2 %v558_v39, %s1538_s11  ;;  %v556_v40 = vld.sshfl [vmem:[#allocation1] sm:$0xff pattern:$0x73625140]  ;;  %v1292_v39 = vld [vmem:[%s2050_s2 + $0x8] sm:$0xff] }
 0x186   : > { %562 = vrot.lane.b32.xlu1 %v556_v40, %s1538_s11  ;;  %720 = vst [vmem:[#allocation1] ss:$4 sm:$0xff] %v1648_v13  ;;  %s1556_s11 = smov 122  }
 0x18d   : > { %v723_v41 = vld.sshfl [vmem:[#allocation1 + $0x8] sm:$0xff pattern:$0x73625140]  ;;  %v721_v42 = vld.sshfl [vmem:[#allocation1] sm:$0xff pattern:$0x73625140] }
 0x18e   : > { %548 = vrot.lane.b32.xlu1 %v542_v35, %s1555_s29  ;;  %729 = vrot.lane.b32.xlu0 %v723_v41, %s1553_s27  ;;  %v725_v43 = vld.sshfl [vmem:[#allocation1 + $0x10] sm:$0xff pattern:$0x73625140] }
 0x18f   : > { %727 = vrot.lane.b32.xlu2 %v721_v42, %s1553_s27 }
 0x196   : > { %731 = vrot.lane.b32.xlu1 %v725_v43, %s1553_s27  ;;  %819 = vperm.xlu0 %1346, %v809_v7   ;;  %v811_v43 = vld [vmem:[%s2051_s3 + $0x18] sm:$0xff] }
 0x197   : > { %814 = vperm.xlu2 %1345, %v808_v20  }
 0x19e   : > { %824 = vperm.xlu1 %1347, %v810_v0   ;;  %872 = vperm.xlu0 %1346, %v858_v11  }
 0x19f   : > { %829 = vperm.xlu2 %1345, %v811_v43  }
 0x1a1   : > { %v447_v44 = vpop.permute.xlu2 %446 }
 0x1a6   : > { %862 = vperm.xlu1 %1347, %v856_v3  }
 0x1aa   : > { %v1684_v47 = vpop.permute.xlu2 %463 }
 0x1ae   : > { %877 = vperm.xlu1 %1347, %v859_v8  }
 0x1b3   : > { %v1694_v54 = vpop.permute.xlu2 %479 }
 0x1b8   : > { %v451_v45 = vpop.permute.xlu1 %450  ;;  %v449_v46 = vpop.permute.xlu0 %448 }
 0x1b9   : > { %v1686_v48 = vsel %vm452_vm10, %v447_v44, %v449_v46  ;;  %v454_v49 = vsel %vm452_vm10, %v449_v46, %v451_v45  ;;  %v577_v23 = vsel %vm571_vm12, %v1655_v16, %v451_v45  ;;  %v1290_v45 = vld [vmem:[%s2049_s1 + $0x8] sm:$0xff]  ;;  %vm1142_vm10 = vcmask 654336  }
 0x1ba   : > { %v575_v52 = vsel %vm571_vm12, %v1653_v15, %v454_v49  ;;  %v573_v40 = vsel %vm571_vm12, %v1651_v14, %v1686_v48 }
 0x1bb   : > { %v496_v57 = vpop.permute.xlu2 %495 }
 0x1c1   : > { %v468_v50 = vpop.permute.xlu1 %467  ;;  %v1688_v51 = vpop.permute.xlu0 %465 }
 0x1c2   : > { %v470_v53 = vsel %vm319_vm11, %v1688_v51, %v468_v50  ;;  %v584_v25 = vsel %vm578_vm13, %v577_v23, %v468_v50  ;;  %v469_v35 = vsel %vm319_vm11, %v1684_v47, %v1688_v51  ;;  %vm735_vm11 = vcmask 31744  }
 0x1c3   : > { %v1697_v55 = vsel %vm578_vm13, %v575_v52, %v470_v53  ;;  %v580_v41 = vsel %vm578_vm13, %v573_v40, %v469_v35 }
 0x1c4   : > { %v513_v60 = vpop.permute.xlu2 %512 }
 0x1ca   : > { %v1699_v56 = vpop.permute.xlu0 %481  ;;  %v1701_v58 = vpop.permute.xlu1 %483 }
 0x1cb   : > { %v593_v31 = vsel %vm585_vm1, %v584_v25, %v1701_v58  ;;  %v486_v38 = vsel %vm485_vm4, %v1694_v54, %v1699_v56 }
 0x1cc   : > { %v587_v44 = vsel %vm585_vm1, %v580_v41, %v486_v38 }
 0x1cd   : > { %v530_v63 = vpop.permute.xlu2 %529 }
 0x1d3   : > { %v1703_v59 = vpop.permute.xlu0 %497 }
 0x1d4   : > { %v1705_v61 = vpop.permute.xlu1 %499  ;;  %v502_v26 = vsel %vm501_vm2, %v496_v57, %v1703_v59 }
 0x1d5   : > { %v503_v49 = vsel %vm501_vm2, %v1703_v59, %v1705_v61  ;;  %v857_v59 = vld [vmem:[%s2052_s4 + $0x8] sm:$0xff] }
 0x1d6   : > { %867 = vperm.xlu2 %1345, %v857_v59  }
 0x1d7   : > { %v547_v4 = vpop.permute.xlu2 %546 }
 0x1dc   : > { %v1707_v62 = vpop.permute.xlu0 %514 }
 0x1dd   : > { %v1714_v2 = vpop.permute.xlu1 %516  ;;  %v519_v22 = vsel %vm518_vm15, %v513_v60, %v1707_v62 }
 0x1de   : > { %v603_v17 = vsel %vm571_vm12, %v1705_v61, %v1714_v2  ;;  %v597_v28 = vsel %vm571_vm12, %v502_v26, %v519_v22  ;;  %v520_v14 = vsel %vm518_vm15, %v1707_v62, %v1714_v2  ;;  %v487_v61 = vsel %vm485_vm4, %v1699_v56, %v1701_v58 }
 0x1df   : > { %v565_v9 = vpop.permute.xlu2 %564  ;;  %v600_v53 = vsel %vm571_vm12, %v503_v49, %v520_v14  ;;  %v590_v62 = vsel %vm585_vm1, %v1697_v55, %v487_v61  ;;  %vm1152_vm15 = vcmask 916480  }
 0x1e5   : > { %v1712_v1 = vpop.permute.xlu0 %531 }
 0x1e6   : > { %v1721_v6 = vpop.permute.xlu1 %533  ;;  %v536_v24 = vsel %vm535_vm0, %v530_v63, %v1712_v1  ;;  %v1291_v63 = vld [vmem:[%s2050_s2] sm:$0xff] }
 0x1e7   : > { %v609_v19 = vsel %vm578_vm13, %v603_v17, %v1721_v6  ;;  %v605_v32 = vsel %vm578_vm13, %v597_v28, %v536_v24  ;;  %v537_v46 = vsel %vm535_vm0, %v1712_v1, %v1721_v6 }
 0x1e8   : > { %v607_v57 = vsel %vm578_vm13, %v600_v53, %v537_v46  ;;  %vm1000_vm13 = vcmask 932864  }
 0x1e9   : > { %v728_v27 = vpop.permute.xlu2 %727 }
 0x1ee   : > { %v1719_v5 = vpop.permute.xlu0 %550 }
 0x1ef   : > { %v617_v21 = vsel %vm585_vm1, %v609_v19, %v1719_v5 }
 0x1f1   : > { %v815_v56 = vpop.permute.xlu2 %814 }
 0x1f7   : > { %v567_v10 = vpop.permute.xlu0 %566 }
 0x1f8   : > { %v563_v12 = vpop.permute.xlu1 %562  ;;  %v647_v13 = vsel %vm571_vm12, %v567_v10, 0  ;;  %v570_v42 = vsel %vm568_vm14, %v565_v9, %v567_v10 }
 0x1f9   : > { %692 = vmatpush.bf16.msra.mxu2 %v647_v13  ;;  %v569_v15 = vsel %vm568_vm14, %v563_v12, %v565_v9  ;;  %v644_v47 = vsel %vm571_vm12, %v570_v42, 0  ;;  %v1832_v6 = vpop.permute.xlu2 %829  ;;  %vm1101_vm14 = vcmask 818176  }
 0x1fa   : > { %v641_v18 = vsel %vm571_vm12, %v569_v15, 0 }
 0x1fb   : > { %654 = vmatpush.bf16.msra.mxu0 %v641_v18  ;;  %1293 = vmatpush.bf16.msra.mxu1 %v641_v18 }
 0x1fd   : > { %693 = vmatpush.bf16.msra.mxu2 %v617_v21 }
 0x200   : > { %v549_v29 = vpop.permute.xlu1 %548  ;;  %v730_v30 = vpop.permute.xlu0 %729 }
 0x201   : > { %v553_v16 = vsel %vm552_vm3, %v547_v4, %v549_v29  ;;  %694 = vmatpush.bf16.msra.mxu2 %v593_v31  ;;  %v733_v33 = vsel %vm501_vm2, %v728_v27, %v730_v30  ;;  %v554_v50 = vsel %vm552_vm3, %v549_v29, %v1719_v5 }
 0x202   : > { %v611_v36 = vsel %vm585_vm1, %v605_v32, %v553_v16  ;;  %v743_v37 = vsel %vm571_vm12, %v733_v33, 0  ;;  %v614_v60 = vsel %vm585_vm1, %v607_v57, %v554_v50 }
 0x203   : > { %655 = vmatpush.bf16.msra.mxu0 %v611_v36  ;;  %1294 = vmatpush.bf16.msra.mxu1 %v611_v36 }
 0x204   : > { %1296 = vmatpush.bf16.msra.mxu3 %v743_v37  ;;  %1269 = vmatmul.msk.bf16.vlgmr.msra.gmra.mxu2 %vm633_vm5, %v1289_v34 }
 0x205   : > { %758 = vmatpush.bf16.msrb.mxu2 %v743_v37 }
 0x207   : > { %1280 = vmatmul.msk.bf16.vlgmr.msra.gmra.mxu3 %vm735_vm11, %v1292_v39  ;;  %656 = vmatpush.bf16.msra.mxu0 %v587_v44 }
 0x208   : > { %1295 = vmatpush.bf16.msra.mxu1 %v587_v44  ;;  %v732_v48 = vpop.permute.xlu1 %731  ;;  %v1829_v58 = vpop.permute.xlu0 %819 }
 0x209   : > { %v749_v51 = vsel %vm571_vm12, %v732_v48, 0  ;;  %v734_v52 = vsel %vm501_vm2, %v730_v30, %v732_v48 }
 0x20a   : > { %1265 = vmatmul.msk.bf16.vlgmr.msra.gmra.mxu0 %vm633_vm5, %v1289_v34  ;;  %v746_v54 = vsel %vm571_vm12, %v734_v52, 0  ;;  %vm1147_vm12 = vcmask 785408  }
 0x20b   : > { %1266 = vmatmul.msk.bf16.vlgmr.msra.gmra.mxu1 %vm633_vm5, %v1290_v45  ;;  %796 = vmatpush.bf16.msrb.mxu0 %v749_v51 }
 0x20c   : > { %673 = vmatpush.bf16.msrb.mxu1 %v644_v47  ;;  %777 = vmatpush.bf16.msrb.mxu3 %v746_v54 }
 0x210   : > { %674 = vmatpush.bf16.msrb.mxu1 %v614_v60  ;;  %v1827_v55 = vpop.permute.xlu1 %824  ;;  %v1834_v8 = vpop.permute.xlu0 %872 }
 0x214   : > { %675 = vmatpush.bf16.msrb.mxu1 %v590_v62  ;;  %1270 = vmatmul.msk.bf16.gmra.mxu2 %vm633_vm5, %v1290_v45 }
 0x217   : > { %1281 = vmatmul.msk.bf16.vlgmr.msrb.gmra.mxu3 %vm735_vm11, %v1291_v63 }
 0x218   : > { %v863_v3 = vpop.permute.xlu1 %862 }
 0x21a   : > { %1283 = vmatmul.msk.bf16.vlgmr.msrb.gmra.mxu0 %vm735_vm11, %v1291_v63 }
 0x21b   : > { %1267 = vmatmul.msk.bf16.vlgmr.msrb.gmra.mxu1 %vm633_vm5, %v1289_v34 }
 0x220   : > { %v1838_v18 = vpop.permute.xlu1 %877 }
 0x224   : > { %1279 = vmatmul.msk.bf16.vlgmr.msrb.gmra.mxu2 %vm735_vm11, %v1291_v63 }
 0x227   : > { %1282 = vmatmul.msk.bf16.gmra.mxu3 %vm735_vm11, %v1292_v39 }
 0x22a   : > { %1284 = vmatmul.msk.bf16.gmra.mxu0 %vm735_vm11, %v1292_v39 }
 0x22b   : > { %1268 = vmatmul.msk.bf16.gmra.mxu1 %vm633_vm5, %v1290_v45 }
 0x230   : > { %v868_v36 = vpop.permute.xlu2 %867 }
 0x287   : > { %v696_v1 = vpop.f32.mrf.mxu2  ;;  %v658_v2 = vpop.f32.mrf.mxu0 }
 0x288   : > { %v663_v0 = vpop.f32.mrf.mxu1  ;;  %v834_v28 = vmul.f32 %v815_v56, %v696_v1  ;;  %v832_v45 = vmul.f32 %v815_v56, %v658_v2 }
 0x289   : > { %v838_v5 = vmul.f32 %v1827_v55, %v663_v0 }
 0x28a   : > { %v765_v4 = vpop.f32.mrf.mxu3 }
 0x28b   : > { %v850_v7 = vadd.f32 %v838_v5, %v765_v4 }
 0x28d   : > { %v886_v13 = vadd.f32 %v1834_v8, %v850_v7 }
 0x28f   : > { %v698_v10 = vpop.f32.mrf.mxu2  ;;  %v660_v15 = vpop.f32.mrf.mxu0  ;;  %v1841_v20 = vmax.f32 %v886_v13, 0.0 }
 0x290   : > { %v665_v9 = vpop.f32.mrf.mxu1  ;;  %v837_v46 = vmul.f32 %v1829_v58, %v698_v10  ;;  %v835_v57 = vmul.f32 %v1829_v58, %v660_v15 }
 0x291   : > { %v841_v11 = vmul.f32 %v1832_v6, %v665_v9 }
 0x292   : > { %v767_v12 = vpop.f32.mrf.mxu3 }
 0x293   : > { %v853_v17 = vadd.f32 %v841_v11, %v767_v12 }
 0x295   : > { %v889_v19 = vadd.f32 %v1838_v18, %v853_v17 }
 0x297   : > { %v1843_v21 = vmax.f32 %v889_v19, 0.0  ;;  %v701_v23 = vpop.f32.mrf.mxu2  ;;  %v798_v27 = vpop.f32.mrf.mxu0 }
 0x298   : > { %v677_v22 = vpop.f32.mrf.mxu1  ;;  %v846_v30 = vadd.f32 %v834_v28, %v798_v27  ;;  %v840_v60 = vmul.f32 %v1827_v55, %v701_v23 }
 0x299   : > { %v1358_v24 = vpack.i.bf16 %v1843_v21, %v1841_v20  ;;  %v833_v25 = vmul.f32 %v815_v56, %v677_v22 }
 0x29a   : > { %v779_v26 = vpop.f32.mrf.mxu3  ;;  %v1855_v37 = vadd.f32 %v863_v3, %v846_v30 }
 0x29b   : > { %1359 = vrot.lane.b32.xlu1 %v1358_v24, %s1556_s11  ;;  %1354 = vrot.lane.b32.xlu2 %v1358_v24, %s1544_s17  ;;  %v845_v29 = vadd.f32 %v833_v25, %v779_v26 }
 0x29c   : > { %1349 = vrot.lane.b32.xlu0 %v1358_v24, %s1539_s12  ;;  %v894_v41 = vmax.f32 %v1855_v37, 0.0 }
 0x29d   : > { %v881_v33 = vadd.f32 %v863_v3, %v845_v29 }
 0x29f   : > { %v1850_v16 = vpop.f32.mrf.mxu2  ;;  %v893_v39 = vmax.f32 %v881_v33, 0.0  ;;  %v800_v44 = vpop.f32.mrf.mxu0 }
 0x2a0   : > { %v679_v31 = vpop.f32.mrf.mxu1  ;;  %v849_v49 = vadd.f32 %v837_v46, %v800_v44  ;;  %v843_v26 = vmul.f32 %v1832_v6, %v1850_v16 }
 0x2a1   : > { %v836_v32 = vmul.f32 %v1829_v58, %v679_v31  ;;  %v1378_v14 = vpack.i.bf16 %v894_v41, %v893_v39 }
 0x2a2   : > { %v781_v34 = vpop.f32.mrf.mxu3  ;;  %v885_v53 = vadd.f32 %v868_v36, %v849_v49 }
 0x2a3   : > { %v848_v35 = vadd.f32 %v836_v32, %v781_v34  ;;  %1374 = vrot.lane.b32.xlu1 %v1358_v24, %s1557_s14  ;;  %1369 = vrot.lane.b32.xlu2 %v1358_v24, %s1558_s15 }
 0x2a4   : > { %1364 = vrot.lane.b32.xlu0 %v1358_v24, %s1559_s16  ;;  %v897_v56 = vmax.f32 %v885_v53, 0.0 }
 0x2a5   : > { %v884_v38 = vadd.f32 %v868_v36, %v848_v35 }
 0x2a6   : > { %v1508_v30 = vpack.i.bf16 %v897_v56, %v894_v41 }
 0x2a7   : > { %v1858_v40 = vmax.f32 %v884_v38, 0.0  ;;  %v760_v42 = vpop.f32.mrf.mxu2  ;;  %v803_v59 = vpop.f32.mrf.mxu0 }
 0x2a8   : > { %v844_v47 = vadd.f32 %v832_v45, %v760_v42  ;;  %v682_v48 = vpop.f32.mrf.mxu1  ;;  %v852_v0 = vadd.f32 %v840_v60, %v803_v59 }
 0x2a9   : > { %v1393_v43 = vpack.i.bf16 %v1858_v40, %v893_v39  ;;  %v839_v50 = vmul.f32 %v1827_v55, %v682_v48  ;;  %v1413_v2 = vpack.i.bf16 %v897_v56, %v1858_v40 }
 0x2aa   : > { %v880_v51 = vadd.f32 %v863_v3, %v844_v47  ;;  %v784_v52 = vpop.f32.mrf.mxu3  ;;  %v888_v58 = vadd.f32 %v1834_v8, %v852_v0 }
 0x2ab   : > { %1394 = vrot.lane.b32.xlu1 %v1393_v43, %s1540_s13  ;;  %1389 = vrot.lane.b32.xlu2 %v1393_v43, %s1552_s26  ;;  %v851_v62 = vadd.f32 %v839_v50, %v784_v52 }
 0x2ac   : > { %1379 = vrot.lane.b32.xlu0 %v1378_v14, %s1560_s20  ;;  %v1874_v61 = vmax.f32 %v880_v51, 0.0  ;;  %v900_v7 = vmax.f32 %v888_v58, 0.0 }
 0x2ad   : > { %v887_v1 = vadd.f32 %v1834_v8, %v851_v62 }
 0x2ae   : > { %v1418_v3 = vpack.i.bf16 %v893_v39, %v1874_v61 }
 0x2af   : > { %v762_v54 = vpop.f32.mrf.mxu2  ;;  %v899_v55 = vmax.f32 %v887_v1, 0.0  ;;  %v805_v25 = vpop.f32.mrf.mxu0 }
 0x2b0   : > { %v847_v63 = vadd.f32 %v835_v57, %v762_v54  ;;  %v684_v8 = vpop.f32.mrf.mxu1  ;;  %v855_v27 = vadd.f32 %v843_v26, %v805_v25 }
 0x2b1   : > { %v1423_v9 = vpack.i.bf16 %v899_v55, %v1841_v20  ;;  %v1428_v10 = vpack.i.bf16 %v900_v7, %v899_v55  ;;  %v842_v12 = vmul.f32 %v1832_v6, %v684_v8 }
 0x2b2   : > { %v883_v4 = vadd.f32 %v868_v36, %v847_v63  ;;  %v786_v13 = vpop.f32.mrf.mxu3  ;;  %v891_v28 = vadd.f32 %v1838_v18, %v855_v27 }
 0x2b3   : > { %1409 = vrot.lane.b32.xlu1 %v1393_v43, %s1561_s21  ;;  %1404 = vrot.lane.b32.xlu2 %v1393_v43, %s1562_s22  ;;  %v854_v15 = vadd.f32 %v842_v12, %v786_v13 }
 0x2b4   : > { %1384 = vrot.lane.b32.xlu0 %v1393_v43, %s1563_s23  ;;  %v1882_v5 = vmax.f32 %v883_v4, 0.0  ;;  %v903_v29 = vmax.f32 %v891_v28, 0.0 }
 0x2b5   : > { %v890_v17 = vadd.f32 %v1838_v18, %v854_v15 }
 0x2b6   : > { %v1443_v11 = vpack.i.bf16 %v1882_v5, %v1874_v61  ;;  %v1463_v19 = vpack.i.bf16 %v1858_v40, %v1882_v5  ;;  %v1513_v6 = vpack.i.bf16 %v903_v29, %v900_v7 }
 0x2b7   : > { %v902_v22 = vmax.f32 %v890_v17, 0.0 }
 0x2b9   : > { %v1473_v23 = vpack.i.bf16 %v902_v22, %v899_v55  ;;  %v1468_v24 = vpack.i.bf16 %v902_v22, %v1843_v21  ;;  %v1503_v31 = vpack.i.bf16 %v903_v29, %v902_v22 }
 0x2bb   : > { %1414 = vrot.lane.b32.xlu1 %v1413_v2, %s1560_s20  ;;  %1419 = vrot.lane.b32.xlu2 %v1418_v3, %s1564_s25 }
 0x2bc   : > { %1399 = vrot.lane.b32.xlu0 %v1393_v43, %s1549_s24 }
 0x2c3   : > { %1424 = vrot.lane.b32.xlu1 %v1423_v9, %s1564_s25  ;;  %1429 = vrot.lane.b32.xlu2 %v1428_v10, %s1560_s20 }
 0x2c4   : > { %1444 = vrot.lane.b32.xlu0 %v1443_v11, %s1556_s11 }
 0x2cb   : > { %1439 = vrot.lane.b32.xlu1 %v1443_v11, %s1544_s17  ;;  %1434 = vrot.lane.b32.xlu2 %v1443_v11, %s1539_s12  ;;  %s1565_s12 = smov 98  }
 0x2cc   : > { %1459 = vrot.lane.b32.xlu0 %v1443_v11, %s1557_s14 }
 0x2d3   : > { %1454 = vrot.lane.b32.xlu1 %v1443_v11, %s1558_s15  ;;  %1449 = vrot.lane.b32.xlu2 %v1443_v11, %s1559_s16 }
 0x2d4   : > { %1464 = vrot.lane.b32.xlu0 %v1463_v19, %s1564_s25 }
 0x2db   : > { %1474 = vrot.lane.b32.xlu1 %v1473_v23, %s1563_s23  ;;  %1469 = vrot.lane.b32.xlu2 %v1468_v24, %s1564_s25 }
 0x2dc   : > { %1479 = vrot.lane.b32.xlu0 %v1473_v23, %s1552_s26 }
 0x2e3   : > { %1489 = vrot.lane.b32.xlu1 %v1473_v23, %s1549_s24  ;;  %1484 = vrot.lane.b32.xlu2 %v1473_v23, %s1540_s13  ;;  %s1288_s13 = sshll.u32 %s2055_s19, 5 }
 0x2e4   : > { %1494 = vrot.lane.b32.xlu0 %v1473_v23, %s1562_s22  ;;  %s2020_s24 = scalar_lea.vmem %s2053_s5, %s1288_s13 }
 0x2eb   : > { %1509 = vrot.lane.b32.xlu1 %v1508_v30, %s1565_s12  ;;  %1499 = vrot.lane.b32.xlu2 %v1473_v23, %s1561_s21 }
 0x2ec   : > { %1504 = vrot.lane.b32.xlu0 %v1503_v31, %s1560_s20 }
 0x2f3   : > { %1514 = vrot.lane.b32.xlu2 %v1513_v6, %s1565_s12 }
 0x2f5   : > { %v1355_v16 = vpop.permute.xlu2 %1354 }
 0x2f6   : > { %v1357_v38 = vunpack.i.h.bf16 %v1355_v16  ;;  %v1356_v39 = vunpack.i.l.bf16 %v1355_v16 }
 0x2fd   : > { %v1370_v32 = vpop.permute.xlu2 %1369 }
 0x2fe   : > { %v1371_v52 = vunpack.i.l.bf16 %v1370_v32 }
 0x305   : > { %v1390_v33 = vpop.permute.xlu2 %1389 }
 0x306   : > { %v1392_v7 = vunpack.i.h.bf16 %v1390_v33  ;;  %v1391_v9 = vunpack.i.l.bf16 %v1390_v33 }
 0x30d   : > { %v1360_v34 = vpop.permute.xlu1 %1359  ;;  %v1911_v18 = vpop.permute.xlu2 %1404 }
 0x30e   : > { %v1350_v35 = vpop.permute.xlu0 %1349  ;;  %v1362_v40 = vunpack.i.h.bf16 %v1360_v34  ;;  %v1361_v41 = vunpack.i.l.bf16 %v1360_v34  ;;  %v1407_v23 = vunpack.i.h.bf16 %v1911_v18  ;;  %v1406_v24 = vunpack.i.l.bf16 %v1911_v18 }
 0x30f   : > { %v1352_v36 = vunpack.i.h.bf16 %v1350_v35  ;;  %v1351_v37 = vunpack.i.l.bf16 %v1350_v35 }
 0x311   : > { %v1126_v42 = vsel %vm1122_vm6, %v1843_v21, %v1352_v36  ;;  %v1125_v43 = vsel %vm1122_vm6, %v1841_v20, %v1351_v37  ;;  %v1372_v21 = vunpack.i.h.bf16 %v1370_v32 }
 0x312   : > { %v1130_v44 = vsel %vm1127_vm7, %v1125_v43, %v1356_v39  ;;  %v1131_v14 = vsel %vm1127_vm7, %v1126_v42, %v1357_v38 }
 0x313   : > { %v1135_v45 = vsel %vm1132_vm8, %v1130_v44, %v1361_v41  ;;  %v1136_v46 = vsel %vm1132_vm8, %v1131_v14, %v1362_v40 }
 0x315   : > { %v1375_v47 = vpop.permute.xlu1 %1374  ;;  %v1921_v48 = vpop.permute.xlu2 %1419 }
 0x316   : > { %v1365_v49 = vpop.permute.xlu0 %1364  ;;  %v1377_v20 = vunpack.i.h.bf16 %v1375_v47  ;;  %v1376_v53 = vunpack.i.l.bf16 %v1375_v47  ;;  %v1422_v36 = vunpack.i.h.bf16 %v1921_v48  ;;  %v1421_v37 = vunpack.i.l.bf16 %v1921_v48 }
 0x317   : > { %v1367_v50 = vunpack.i.h.bf16 %v1365_v49  ;;  %v1366_v51 = vunpack.i.l.bf16 %v1365_v49 }
 0x318   : > { %v1962_v14 = vsel %vm1000_vm13, %v1421_v37, %v1422_v36 }
 0x319   : > { %v1140_v54 = vsel %vm1137_vm9, %v1135_v45, %v1366_v51  ;;  %v1141_v57 = vsel %vm1137_vm9, %v1136_v46, %v1367_v50 }
 0x31a   : > { %v1145_v59 = vsel %vm1142_vm10, %v1140_v54, %v1371_v52  ;;  %v1146_v60 = vsel %vm1142_vm10, %v1141_v57, %v1372_v21 }
 0x31b   : > { %v1928_v62 = vsel %vm1147_vm12, %v1145_v59, %v1376_v53  ;;  %v1931_v63 = vsel %vm1147_vm12, %v1146_v60, %v1377_v20 }
 0x31d   : > { %v1395_v56 = vpop.permute.xlu1 %1394  ;;  %v1430_v0 = vpop.permute.xlu2 %1429 }
 0x31e   : > { %v1380_v1 = vpop.permute.xlu0 %1379  ;;  %v1397_v12 = vunpack.i.h.bf16 %v1395_v56  ;;  %v1396_v13 = vunpack.i.l.bf16 %v1395_v56  ;;  %v1432_v40 = vunpack.i.h.bf16 %v1430_v0  ;;  %v1431_v41 = vunpack.i.l.bf16 %v1430_v0 }
 0x31f   : > { %v1382_v38 = vunpack.i.h.bf16 %v1380_v1  ;;  %v1381_v39 = vunpack.i.l.bf16 %v1380_v1 }
 0x320   : > { %v1104_v49 = vsel %vm1101_vm14, %v1431_v41, %v1432_v40 }
 0x321   : > { %v1967_v47 = vsel %vm1101_vm14, %v1381_v39, %v1382_v38 }
 0x325   : > { %v1933_v2 = vpop.permute.xlu1 %1409  ;;  %v1435_v3 = vpop.permute.xlu2 %1434 }
 0x326   : > { %v1385_v4 = vpop.permute.xlu0 %1384  ;;  %v1437_v42 = vunpack.i.h.bf16 %v1435_v3  ;;  %v1436_v43 = vunpack.i.l.bf16 %v1435_v3  ;;  %v1412_v48 = vunpack.i.h.bf16 %v1933_v2  ;;  %v1411_v21 = vunpack.i.l.bf16 %v1933_v2 }
 0x327   : > { %v1387_v58 = vunpack.i.h.bf16 %v1385_v4  ;;  %v1386_v55 = vunpack.i.l.bf16 %v1385_v4 }
 0x328   : > { %v1124_v52 = vsel %vm1122_vm6, %v1882_v5, %v1437_v42  ;;  %v1123_v20 = vsel %vm1122_vm6, %v1874_v61, %v1436_v43 }
 0x329   : > { %v1157_v10 = vsel %vm1122_vm6, %v1386_v55, %v1391_v9  ;;  %v1158_v11 = vsel %vm1122_vm6, %v1387_v58, %v1392_v7 }
 0x32a   : > { %v1161_v25 = vsel %vm1127_vm7, %v1157_v10, %v1396_v13  ;;  %v1162_v26 = vsel %vm1127_vm7, %v1158_v11, %v1397_v12 }
 0x32d   : > { %v1937_v8 = vpop.permute.xlu1 %1414  ;;  %v1939_v22 = vpop.permute.xlu2 %1449 }
 0x32e   : > { %v1400_v15 = vpop.permute.xlu0 %1399  ;;  %v1417_v56 = vunpack.i.h.bf16 %v1937_v8  ;;  %v1416_v0 = vunpack.i.l.bf16 %v1937_v8  ;;  %v1452_v1 = vunpack.i.h.bf16 %v1939_v22  ;;  %v1451_v3 = vunpack.i.l.bf16 %v1939_v22 }
 0x32f   : > { %v1402_v17 = vunpack.i.h.bf16 %v1400_v15  ;;  %v1401_v19 = vunpack.i.l.bf16 %v1400_v15 }
 0x331   : > { %v1165_v27 = vsel %vm1132_vm8, %v1161_v25, %v1401_v19  ;;  %v1166_v28 = vsel %vm1132_vm8, %v1162_v26, %v1402_v17 }
 0x332   : > { %v1169_v29 = vsel %vm1137_vm9, %v1165_v27, %v1406_v24  ;;  %v1170_v30 = vsel %vm1137_vm9, %v1166_v28, %v1407_v23 }
 0x333   : > { %v1173_v61 = vsel %vm1142_vm10, %v1169_v29, %v1411_v21  ;;  %v1174_v4 = vsel %vm1142_vm10, %v1170_v30, %v1412_v48 }
 0x335   : > { %v1425_v31 = vpop.permute.xlu1 %1424  ;;  %v1949_v16 = vpop.permute.xlu2 %1469 }
 0x336   : > { %v1445_v6 = vpop.permute.xlu0 %1444  ;;  %v1427_v53 = vunpack.i.h.bf16 %v1425_v31  ;;  %v1426_v54 = vunpack.i.l.bf16 %v1425_v31  ;;  %v1472_v11 = vunpack.i.h.bf16 %v1949_v16  ;;  %v1471_v8 = vunpack.i.l.bf16 %v1949_v16 }
 0x337   : > { %v1446_v2 = vunpack.i.l.bf16 %v1445_v6  ;;  %v1447_v58 = vunpack.i.h.bf16 %v1445_v6 }
 0x338   : > { %v1003_v10 = vsel %vm1000_vm13, %v1426_v54, %v1427_v53  ;;  %v1004_v54 = vsel %vm1000_vm13, %v1471_v8, %v1472_v11 }
 0x33d   : > { %v1440_v32 = vpop.permute.xlu1 %1439  ;;  %v1953_v34 = vpop.permute.xlu2 %1484 }
 0x33e   : > { %v1951_v33 = vpop.permute.xlu0 %1459  ;;  %v1441_v44 = vunpack.i.l.bf16 %v1440_v32  ;;  %v1442_v50 = vunpack.i.h.bf16 %v1440_v32  ;;  %v1486_v15 = vunpack.i.l.bf16 %v1953_v34  ;;  %v1487_v24 = vunpack.i.h.bf16 %v1953_v34 }
 0x33f   : > { %v1461_v23 = vunpack.i.l.bf16 %v1951_v33 }
 0x340   : > { %v1128_v57 = vsel %vm1127_vm7, %v1123_v20, %v1441_v44  ;;  %v1129_v5 = vsel %vm1127_vm7, %v1124_v52, %v1442_v50  ;;  %v1103_v44 = vsel %vm1101_vm14, %v1416_v0, %v1417_v56  ;;  %v1155_v50 = vsel %vm1152_vm15, %v1928_v62, %v1003_v10 }
 0x341   : > { %v1133_v55 = vsel %vm1132_vm8, %v1128_v57, %v1446_v2  ;;  %v1134_v13 = vsel %vm1132_vm8, %v1129_v5, %v1447_v58  ;;  %v1178_v62 = vsel %vm1147_vm12, %v1174_v4, %v1103_v44 }
 0x342   : > { %v1138_v25 = vsel %vm1137_vm9, %v1133_v55, %v1451_v3  ;;  %v1139_v32 = vsel %vm1137_vm9, %v1134_v13, %v1452_v1 }
 0x345   : > { %v1955_v18 = vpop.permute.xlu1 %1454  ;;  %v1964_v45 = vpop.permute.xlu2 %1499 }
 0x346   : > { %v1957_v35 = vpop.permute.xlu0 %1464  ;;  %v1457_v17 = vunpack.i.h.bf16 %v1955_v18  ;;  %v1456_v19 = vunpack.i.l.bf16 %v1955_v18  ;;  %v1501_v18 = vunpack.i.l.bf16 %v1964_v45  ;;  %v1502_v0 = vunpack.i.h.bf16 %v1964_v45 }
 0x347   : > { %v1467_v16 = vunpack.i.h.bf16 %v1957_v35  ;;  %v1466_v36 = vunpack.i.l.bf16 %v1957_v35 }
 0x348   : > { %v1143_v37 = vsel %vm1142_vm10, %v1138_v25, %v1456_v19  ;;  %v1144_v38 = vsel %vm1142_vm10, %v1139_v32, %v1457_v17 }
 0x349   : > { %v1002_v52 = vsel %vm1000_vm13, %v1466_v36, %v1467_v16 }
 0x34d   : > { %v1475_v46 = vpop.permute.xlu1 %1474  ;;  %v1515_v29 = vpop.permute.xlu2 %1514 }
 0x34e   : > { %v1480_v51 = vpop.permute.xlu0 %1479  ;;  %v1476_v60 = vunpack.i.l.bf16 %v1475_v46  ;;  %v1477_v9 = vunpack.i.h.bf16 %v1475_v46  ;;  %v1516_v40 = vunpack.i.l.bf16 %v1515_v29  ;;  %v1462_v46 = vunpack.i.h.bf16 %v1951_v33 }
 0x34f   : > { %v1481_v59 = vunpack.i.l.bf16 %v1480_v51  ;;  %v1482_v7 = vunpack.i.h.bf16 %v1480_v51  ;;  %v1148_v51 = vsel %vm1147_vm12, %v1143_v37, %v1461_v23  ;;  %v1177_v33 = vsel %vm1147_vm12, %v1173_v61, %v1967_v47 }
 0x350   : > { %v1153_v2 = vsel %vm1152_vm15, %v1148_v51, %v1962_v14  ;;  %v1517_v3 = vunpack.i.h.bf16 %v1515_v29  ;;  %v1156_v14 = vsel %vm1152_vm15, %v1931_v63, %v1004_v54 }
 0x351   : > { %v1159_v12 = vsel %vm1122_vm6, %v1476_v60, %v1481_v59  ;;  %v1160_v28 = vsel %vm1122_vm6, %v1477_v9, %v1482_v7 }
 0x352   : > { %v1163_v6 = vsel %vm1127_vm7, %v1159_v12, %v1486_v15  ;;  %v1164_v42 = vsel %vm1127_vm7, %v1160_v28, %v1487_v24 }
 0x355   : > { %v1490_v22 = vpop.permute.xlu1 %1489 }
 0x356   : > { %v1495_v26 = vpop.permute.xlu0 %1494  ;;  %v1491_v27 = vunpack.i.l.bf16 %v1490_v22  ;;  %v1492_v31 = vunpack.i.h.bf16 %v1490_v22 }
 0x357   : > { %v1496_v30 = vunpack.i.l.bf16 %v1495_v26  ;;  %v1497_v41 = vunpack.i.h.bf16 %v1495_v26 }
 0x358   : > { %v1167_v34 = vsel %vm1132_vm8, %v1163_v6, %v1491_v27  ;;  %v1168_v48 = vsel %vm1132_vm8, %v1164_v42, %v1492_v31 }
 0x359   : > { %v1171_v39 = vsel %vm1137_vm9, %v1167_v34, %v1496_v30  ;;  %v1172_v57 = vsel %vm1137_vm9, %v1168_v48, %v1497_v41 }
 0x35a   : > { %v1175_v43 = vsel %vm1142_vm10, %v1171_v39, %v1501_v18  ;;  %v1176_v45 = vsel %vm1142_vm10, %v1172_v57, %v1502_v0 }
 0x35b   : > { %v1179_v35 = vsel %vm1147_vm12, %v1175_v43, %v1104_v49  ;;  %v1149_v49 = vsel %vm1147_vm12, %v1144_v38, %v1462_v46 }
 0x35c   : > { %v1183_v21 = vsel %vm1152_vm15, %v1179_v35, %v1516_v40  ;;  %v1154_v5 = vsel %vm1152_vm15, %v1149_v49, %v1002_v52 }
 0x35d   : > { %v1187_v20 = vpack.c.bf16 %v1183_v21, %v1155_v50  ;;  %v1510_v53 = vpop.permute.xlu1 %1509 }
 0x35e   : > { %v1505_v59 = vpop.permute.xlu0 %1504  ;;  %v1512_v60 = vunpack.i.h.bf16 %v1510_v53  ;;  %v1511_v56 = vunpack.i.l.bf16 %v1510_v53 }
 0x35f   : > { %v1507_v1 = vunpack.i.h.bf16 %v1505_v59  ;;  %v1506_v47 = vunpack.i.l.bf16 %v1505_v59  ;;  %1191 = vst [vmem:[%s2020_s24 + $0x10] sm:$0xff] %v1187_v20 }
 0x360   : > { %v1181_v61 = vsel %vm1152_vm15, %v1177_v33, %v1511_v56  ;;  %v1182_v4 = vsel %vm1152_vm15, %v1178_v62, %v1512_v60 }
 0x361   : > { %v1105_v58 = vsel %vm1101_vm14, %v1506_v47, %v1507_v1  ;;  %v1185_v55 = vpack.c.bf16 %v1181_v61, %v1153_v2  ;;  %v1186_v7 = vpack.c.bf16 %v1182_v4, %v1154_v5 }
 0x362   : > { %v1180_v9 = vsel %vm1147_vm12, %v1176_v45, %v1105_v58 }
 0x363   : > { %v1184_v10 = vsel %vm1152_vm15, %v1180_v9, %v1517_v3  ;;  %1189 = vst [vmem:[%s2020_s24] sm:$0xff] %v1185_v55 }
 0x364   : > { %v1188_v11 = vpack.c.bf16 %v1184_v10, %v1156_v14  ;;  %1190 = vst [vmem:[%s2020_s24 + $0x8] sm:$0xff] %v1186_v7 }
 0x366   : > { %1192 = vst [vmem:[%s2020_s24 + $0x18] sm:$0xff] %v1188_v11 }
 0x367 PF: > { %s15_s18 = sadd.s32 1, %s1524_s18  }
 0x368   : > { %p12_p4 = scmp.ge.s32.totalorder %s15_s18, 4  }
 0x36a   :  { %14 = sbr.rel (!%p12_p4) target bundleno = 1 (0x1), region = 76 }

</bundles_post_ra>
